<compile_context>
chip_gen: v7x
topology: tpu7x:2x2x1
jax: 0.10.0
libtpu: 0.0.40
codegen_flags: <defaults>
</compile_context>

<pallas_src>
import functools

import numpy as np
import jax
import jax.numpy as jnp
from jax.experimental import pallas as pl
from jax.experimental.pallas import tpu as pltpu


def _round_up(x, m):
    return (x + m - 1) // m * m


def _wdup_rowpair_matrix(W):
    """(W, 4W) 0/1 matrix E with E[w, a*2W + q] = 1 iff q // 2 == w  (a in {0, 1}).

    For one source row y_h (Cout, W):  y_h @ E = [wdup(y_h) | wdup(y_h)]  (Cout, 4W),
    i.e. the two width-duplicated output rows 2h and 2h+1 laid out contiguously.
    Built with numpy so it becomes a compile-time constant (no per-call XLA op).
    """
    m = np.arange(4 * W)
    src = (m % (2 * W)) // 2
    return (src[None, :] == np.arange(W)[:, None]).astype(np.float32)


def _pick_row_chunk(H, W, Cin, Cout, budget_bytes=4 * 1024 * 1024, max_unroll=64):
    """How many source rows each grid step processes (always a divisor of H).

    Keeps the double-buffered input/output block footprint under `budget_bytes`
    (important on v7x: 64 MiB physical / 32 MiB scoped-default VMEM) and bounds the
    in-kernel unrolled row loop.  Chunks keep blocks (8,128)-legal: hc % 8 == 0 and
    (hc*W) % 128 == 0, unless hc == H (full-dim blocks are always legal).
    """
    def per_step_bytes(hc):
        x_blk = Cin * hc * W * 4
        o_blk = Cout * hc * _round_up(4 * W, 128) * 4      # output lanes pad to 128
        return 2 * (x_blk + o_blk)                         # double-buffered pipeline

    if H <= max_unroll and per_step_bytes(H) <= budget_bytes:
        return H
    for hc in range(min(H, max_unroll), 0, -1):
        if H % hc:
            continue
        if hc != H and (hc % 8 or (hc * W) % 128):
            continue
        if per_step_bytes(hc) <= budget_bytes:
            return hc
    return H   # fallback: whole image per step (extreme shapes only)


# ----------------------------------------------------------------------------
# Fused kernel: BN + ReLU + 1x1 (transposed) conv + nearest x2 upsample
# ----------------------------------------------------------------------------
def _transition_block_kernel(x_ref, s_ref, b_ref, wt_ref, e_ref, o_ref, *, hc, w):
    # x_ref : (Cin, Hc*W)    chunk of Hc source rows, pixels lane-dense
    # s_ref : (Cin, 1)       folded BN scale
    # b_ref : (Cin, 1)       folded BN shift
    # wt_ref: (Cout, Cin)    ConvTranspose2d 1x1 weight, transposed to (out, in)
    # e_ref : (W, 4W)        row-pair width-duplication matrix (0/1 compile-time constant)
    # o_ref : (Cout, Hc, 4W) o_ref[:, h, :] holds output rows 2h and 2h+1 (two 2W halves)
    x = x_ref[...].astype(jnp.float32)
    xact = jnp.maximum(x * s_ref[...] + b_ref[...], 0.0)              # folded BN + ReLU (VPU)

    # 1x1 ConvTranspose2d (stride 1) == channel matmul on the MXU.
    y = jnp.dot(wt_ref[...], xact, preferred_element_type=jnp.float32)   # (Cout, Hc*W)

    # Nearest x2 upsample, one source row at a time: a tiny (W, 4W) dot duplicates the W
    # axis and lays the output row-pair out contiguously.  Static slices / plain stores
    # only — no relayouting reshapes, no O((HW)^2) selection matrix.
    e = e_ref[...]
    for h in range(hc):                                               # static unroll, hc bounded
        row = y[:, h * w:(h + 1) * w]                                 # (Cout, W)
        up = jnp.dot(row, e, preferred_element_type=jnp.float32)      # (Cout, 4W)
        o_ref[:, h, :] = up.astype(o_ref.dtype)


def transition_block(x_nchw, gamma, beta, mean, var, w_io, *, eps=1e-5):
    """TransitionBlock forward (eval-mode BN, dropRate=0).

    x_nchw: (N, Cin, H, W); w_io: (Cin, Cout) (ConvTranspose2d weight with the 1x1 dims squeezed)
    returns (N, Cout, 2H, 2W)
    """
    N, Cin, H, W = x_nchw.shape
    Cout = w_io.shape[1]
    HW = H * W

    # Fold eval-mode BatchNorm into per-channel scale/shift (trace-time, free).
    s = gamma / jnp.sqrt(var + eps)
    b = beta - mean * s
    wt = w_io.T                                                       # (Cout, Cin)

    Hc = _pick_row_chunk(H, W, Cin, Cout)
    n_hc = H // Hc

    x_flat = x_nchw.reshape(N, Cin, HW)                               # free reshape (contiguous)
    E = _wdup_rowpair_matrix(W)                                       # numpy constant, (W, 4W)

    kern = functools.partial(_transition_block_kernel, hc=Hc, w=W)
    out4 = pl.pallas_call(
        kern,
        out_shape=jax.ShapeDtypeStruct((N, Cout, H, 4 * W), x_nchw.dtype),
        grid=(N, n_hc),
        in_specs=[
            pl.BlockSpec((None, Cin, Hc * W), lambda n, h: (n, 0, h)),   # row chunk of image n
            pl.BlockSpec((Cin, 1), lambda n, h: (0, 0)),                 # BN scale (constant block)
            pl.BlockSpec((Cin, 1), lambda n, h: (0, 0)),                 # BN shift (constant block)
            pl.BlockSpec((Cout, Cin), lambda n, h: (0, 0)),              # 1x1 weight (constant block)
            pl.BlockSpec((W, 4 * W), lambda n, h: (0, 0)),               # dup matrix (constant block)
        ],
        out_specs=pl.BlockSpec((None, Cout, Hc, 4 * W), lambda n, h: (n, 0, h, 0)),
        compiler_params=pltpu.CompilerParams(
            dimension_semantics=("parallel", "parallel"),
            vmem_limit_bytes=32 * 1024 * 1024),
    )(x_flat, s.reshape(Cin, 1), b.reshape(Cin, 1), wt, E)

    # (N, Cout, H, 4W) -> (N, Cout, 2H, 2W): free reshape (rows 2h / 2h+1 are the 4W halves).
    return out4.reshape(N, Cout, 2 * H, 2 * W)


# ----------------------------------------------------------------------------
# Pure-JAX reference (same math) for a correctness check
# ----------------------------------------------------------------------------
def reference_forward(x, gamma, beta, mean, var, w_io, eps=1e-5):
    s = (gamma / jnp.sqrt(var + eps))[None, :, None, None]
    b = (beta - mean * gamma / jnp.sqrt(var + eps))[None, :, None, None]
    xact = jnp.maximum(x * s + b, 0.0)
    y = jnp.einsum("nihw,io->nohw", xact, w_io)                       # ConvTranspose2d k=1, s=1
    y = jnp.repeat(jnp.repeat(y, 2, axis=2), 2, axis=3)               # nearest-neighbour x2
    return y


# ----------------------------------------------------------------------------
if __name__ == "__main__":
    key = jax.random.PRNGKey(0)
    kx, kg, kb, km, kv, kw = jax.random.split(key, 6)

    N, Cin, H, W = 2, 32, 16, 16          # TransitionBlock(32, 16) as used in the derain model
    Cout = 16

    x = jax.random.normal(kx, (N, Cin, H, W), jnp.float32)
    gamma = 1.0 + 0.1 * jax.random.normal(kg, (Cin,), jnp.float32)
    beta = 0.1 * jax.random.normal(kb, (Cin,), jnp.float32)
    mean = 0.1 * jax.random.normal(km, (Cin,), jnp.float32)
    var = 1.0 + 0.1 * jax.random.uniform(kv, (Cin,), jnp.float32)
    w_io = 0.1 * jax.random.normal(kw, (Cin, Cout), jnp.float32)      # ConvTranspose2d weight (in,out,1,1) squeezed

    out = transition_block(x, gamma, beta, mean, var, w_io)
    out = jax.block_until_ready(out)

    ref = reference_forward(x, gamma, beta, mean, var, w_io)
    assert out.shape == (N, Cout, 2 * H, 2 * W), out.shape
    max_err = float(jnp.max(jnp.abs(out - ref)))
    assert max_err < 1e-3, max_err

    print("KERNEL_OK")
</pallas_src>

<mosaic_0001>
module attributes {stable_mosaic.version = 11 : i64} {
  func.func @_transition_block_kernel(%arg0: i32, %arg1: i32, %arg2: memref<1x32x256xf32, #tpu.memory_space<vmem>>, %arg3: memref<32x1xf32, #tpu.memory_space<vmem>>, %arg4: memref<32x1xf32, #tpu.memory_space<vmem>>, %arg5: memref<16x32xf32, #tpu.memory_space<vmem>>, %arg6: memref<16x64xf32, #tpu.memory_space<vmem>>, %arg7: memref<1x16x16x64xf32, #tpu.memory_space<vmem>>) attributes {dimension_semantics = [#tpu.dimension_semantics<parallel>, #tpu.dimension_semantics<parallel>], iteration_bounds = array<i64: 2, 1>, scalar_prefetch = 0 : i64, scratch_operands = 0 : i64, tpu.core_type = #tpu.core_type<tc>, window_params = [{transform_indices = @transform_0, window_bounds = array<i64: 1, 32, 256>}, {pipeline_mode = #tpu.pipeline_mode<synchronous>, transform_indices = @transform_1, window_bounds = array<i64: 32, 1>}, {pipeline_mode = #tpu.pipeline_mode<synchronous>, transform_indices = @transform_2, window_bounds = array<i64: 32, 1>}, {pipeline_mode = #tpu.pipeline_mode<synchronous>, transform_indices = @transform_3, window_bounds = array<i64: 16, 32>}, {pipeline_mode = #tpu.pipeline_mode<synchronous>, transform_indices = @transform_4, window_bounds = array<i64: 16, 64>}, {transform_indices = @transform_5, window_bounds = array<i64: 1, 16, 16, 64>}]} {
    %c0 = arith.constant 0 : index
    %c0_0 = arith.constant 0 : index
    %c0_1 = arith.constant 0 : index
    %0 = vector.load %arg2[%c0, %c0_0, %c0_1] : memref<1x32x256xf32, #tpu.memory_space<vmem>>, vector<1x32x256xf32>
    %1 = vector.shape_cast %0 : vector<1x32x256xf32> to vector<32x256xf32>
    %c0_2 = arith.constant 0 : index
    %c0_3 = arith.constant 0 : index
    %2 = vector.load %arg3[%c0_2, %c0_3] : memref<32x1xf32, #tpu.memory_space<vmem>>, vector<32x1xf32>
    %3 = vector.broadcast %2 : vector<32x1xf32> to vector<32x256xf32>
    %4 = arith.mulf %1, %3 : vector<32x256xf32>
    %c0_4 = arith.constant 0 : index
    %c0_5 = arith.constant 0 : index
    %5 = vector.load %arg4[%c0_4, %c0_5] : memref<32x1xf32, #tpu.memory_space<vmem>>, vector<32x1xf32>
    %6 = vector.broadcast %5 : vector<32x1xf32> to vector<32x256xf32>
    %7 = arith.addf %4, %6 : vector<32x256xf32>
    %cst = arith.constant 0.000000e+00 : f32
    %8 = vector.broadcast %cst : f32 to vector<32x256xf32>
    %9 = arith.maximumf %7, %8 : vector<32x256xf32>
    %c0_6 = arith.constant 0 : index
    %c0_7 = arith.constant 0 : index
    %10 = vector.load %arg5[%c0_6, %c0_7] : memref<16x32xf32, #tpu.memory_space<vmem>>, vector<16x32xf32>
    %cst_8 = arith.constant dense<0.000000e+00> : vector<16x256xf32>
    %11 = tpu.matmul %10, %9, %cst_8 {dimension_numbers = #tpu.dot_dimension_numbers<[1], [0], [0], [1], [0, 0, 1, 1], [], []>} : vector<16x32xf32>, vector<32x256xf32>, vector<16x256xf32> -> vector<16x256xf32>
    %c0_9 = arith.constant 0 : index
    %c0_10 = arith.constant 0 : index
    %12 = vector.load %arg6[%c0_9, %c0_10] : memref<16x64xf32, #tpu.memory_space<vmem>>, vector<16x64xf32>
    %13 = vector.extract_strided_slice %11 {offsets = [0, 0], sizes = [16, 16], strides = [1, 1]} : vector<16x256xf32> to vector<16x16xf32>
    %cst_11 = arith.constant dense<0.000000e+00> : vector<16x64xf32>
    %14 = tpu.matmul %13, %12, %cst_11 {dimension_numbers = #tpu.dot_dimension_numbers<[1], [0], [0], [1], [0, 0, 1, 1], [], []>} : vector<16x16xf32>, vector<16x64xf32>, vector<16x64xf32> -> vector<16x64xf32>
    %c0_12 = arith.constant 0 : index
    %c0_13 = arith.constant 0 : index
    %c0_14 = arith.constant 0 : index
    %c0_15 = arith.constant 0 : index
    %15 = vector.load %arg7[%c0_12, %c0_13, %c0_14, %c0_15] : memref<1x16x16x64xf32, #tpu.memory_space<vmem>>, vector<1x16x1x64xf32>
    %16 = vector.shape_cast %15 : vector<1x16x1x64xf32> to vector<16x64xf32>
    %17 = vector.shape_cast %14 : vector<16x64xf32> to vector<1x16x1x64xf32>
    tpu.vector_store %arg7[%c0_12, %c0_13, %c0_14, %c0_15], %17 {strides = array<i32>} : memref<1x16x16x64xf32, #tpu.memory_space<vmem>>, vector<1x16x1x64xf32>,
    %18 = vector.extract_strided_slice %11 {offsets = [0, 16], sizes = [16, 16], strides = [1, 1]} : vector<16x256xf32> to vector<16x16xf32>
    %cst_16 = arith.constant dense<0.000000e+00> : vector<16x64xf32>
    %19 = tpu.matmul %18, %12, %cst_16 {dimension_numbers = #tpu.dot_dimension_numbers<[1], [0], [0], [1], [0, 0, 1, 1], [], []>} : vector<16x16xf32>, vector<16x64xf32>, vector<16x64xf32> -> vector<16x64xf32>
    %c0_17 = arith.constant 0 : index
    %c0_18 = arith.constant 0 : index
    %c1 = arith.constant 1 : index
    %c0_19 = arith.constant 0 : index
    %20 = vector.load %arg7[%c0_17, %c0_18, %c1, %c0_19] : memref<1x16x16x64xf32, #tpu.memory_space<vmem>>, vector<1x16x1x64xf32>
    %21 = vector.shape_cast %20 : vector<1x16x1x64xf32> to vector<16x64xf32>
    %22 = vector.shape_cast %19 : vector<16x64xf32> to vector<1x16x1x64xf32>
    tpu.vector_store %arg7[%c0_17, %c0_18, %c1, %c0_19], %22 {strides = array<i32>} : memref<1x16x16x64xf32, #tpu.memory_space<vmem>>, vector<1x16x1x64xf32>,
    %23 = vector.extract_strided_slice %11 {offsets = [0, 32], sizes = [16, 16], strides = [1, 1]} : vector<16x256xf32> to vector<16x16xf32>
    %cst_20 = arith.constant dense<0.000000e+00> : vector<16x64xf32>
    %24 = tpu.matmul %23, %12, %cst_20 {dimension_numbers = #tpu.dot_dimension_numbers<[1], [0], [0], [1], [0, 0, 1, 1], [], []>} : vector<16x16xf32>, vector<16x64xf32>, vector<16x64xf32> -> vector<16x64xf32>
    %c0_21 = arith.constant 0 : index
    %c0_22 = arith.constant 0 : index
    %c2 = arith.constant 2 : index
    %c0_23 = arith.constant 0 : index
    %25 = vector.load %arg7[%c0_21, %c0_22, %c2, %c0_23] : memref<1x16x16x64xf32, #tpu.memory_space<vmem>>, vector<1x16x1x64xf32>
    %26 = vector.shape_cast %25 : vector<1x16x1x64xf32> to vector<16x64xf32>
    %27 = vector.shape_cast %24 : vector<16x64xf32> to vector<1x16x1x64xf32>
    tpu.vector_store %arg7[%c0_21, %c0_22, %c2, %c0_23], %27 {strides = array<i32>} : memref<1x16x16x64xf32, #tpu.memory_space<vmem>>, vector<1x16x1x64xf32>,
    %28 = vector.extract_strided_slice %11 {offsets = [0, 48], sizes = [16, 16], strides = [1, 1]} : vector<16x256xf32> to vector<16x16xf32>
    %cst_24 = arith.constant dense<0.000000e+00> : vector<16x64xf32>
    %29 = tpu.matmul %28, %12, %cst_24 {dimension_numbers = #tpu.dot_dimension_numbers<[1], [0], [0], [1], [0, 0, 1, 1], [], []>} : vector<16x16xf32>, vector<16x64xf32>, vector<16x64xf32> -> vector<16x64xf32>
    %c0_25 = arith.constant 0 : index
    %c0_26 = arith.constant 0 : index
    %c3 = arith.constant 3 : index
    %c0_27 = arith.constant 0 : index
    %30 = vector.load %arg7[%c0_25, %c0_26, %c3, %c0_27] : memref<1x16x16x64xf32, #tpu.memory_space<vmem>>, vector<1x16x1x64xf32>
    %31 = vector.shape_cast %30 : vector<1x16x1x64xf32> to vector<16x64xf32>
    %32 = vector.shape_cast %29 : vector<16x64xf32> to vector<1x16x1x64xf32>
    tpu.vector_store %arg7[%c0_25, %c0_26, %c3, %c0_27], %32 {strides = array<i32>} : memref<1x16x16x64xf32, #tpu.memory_space<vmem>>, vector<1x16x1x64xf32>,
    %33 = vector.extract_strided_slice %11 {offsets = [0, 64], sizes = [16, 16], strides = [1, 1]} : vector<16x256xf32> to vector<16x16xf32>
    %cst_28 = arith.constant dense<0.000000e+00> : vector<16x64xf32>
    %34 = tpu.matmul %33, %12, %cst_28 {dimension_numbers = #tpu.dot_dimension_numbers<[1], [0], [0], [1], [0, 0, 1, 1], [], []>} : vector<16x16xf32>, vector<16x64xf32>, vector<16x64xf32> -> vector<16x64xf32>
    %c0_29 = arith.constant 0 : index
    %c0_30 = arith.constant 0 : index
    %c4 = arith.constant 4 : index
    %c0_31 = arith.constant 0 : index
    %35 = vector.load %arg7[%c0_29, %c0_30, %c4, %c0_31] : memref<1x16x16x64xf32, #tpu.memory_space<vmem>>, vector<1x16x1x64xf32>
    %36 = vector.shape_cast %35 : vector<1x16x1x64xf32> to vector<16x64xf32>
    %37 = vector.shape_cast %34 : vector<16x64xf32> to vector<1x16x1x64xf32>
    tpu.vector_store %arg7[%c0_29, %c0_30, %c4, %c0_31], %37 {strides = array<i32>} : memref<1x16x16x64xf32, #tpu.memory_space<vmem>>, vector<1x16x1x64xf32>,
    %38 = vector.extract_strided_slice %11 {offsets = [0, 80], sizes = [16, 16], strides = [1, 1]} : vector<16x256xf32> to vector<16x16xf32>
    %cst_32 = arith.constant dense<0.000000e+00> : vector<16x64xf32>
    %39 = tpu.matmul %38, %12, %cst_32 {dimension_numbers = #tpu.dot_dimension_numbers<[1], [0], [0], [1], [0, 0, 1, 1], [], []>} : vector<16x16xf32>, vector<16x64xf32>, vector<16x64xf32> -> vector<16x64xf32>
    %c0_33 = arith.constant 0 : index
    %c0_34 = arith.constant 0 : index
    %c5 = arith.constant 5 : index
    %c0_35 = arith.constant 0 : index
    %40 = vector.load %arg7[%c0_33, %c0_34, %c5, %c0_35] : memref<1x16x16x64xf32, #tpu.memory_space<vmem>>, vector<1x16x1x64xf32>
    %41 = vector.shape_cast %40 : vector<1x16x1x64xf32> to vector<16x64xf32>
    %42 = vector.shape_cast %39 : vector<16x64xf32> to vector<1x16x1x64xf32>
    tpu.vector_store %arg7[%c0_33, %c0_34, %c5, %c0_35], %42 {strides = array<i32>} : memref<1x16x16x64xf32, #tpu.memory_space<vmem>>, vector<1x16x1x64xf32>,
    %43 = vector.extract_strided_slice %11 {offsets = [0, 96], sizes = [16, 16], strides = [1, 1]} : vector<16x256xf32> to vector<16x16xf32>
    %cst_36 = arith.constant dense<0.000000e+00> : vector<16x64xf32>
    %44 = tpu.matmul %43, %12, %cst_36 {dimension_numbers = #tpu.dot_dimension_numbers<[1], [0], [0], [1], [0, 0, 1, 1], [], []>} : vector<16x16xf32>, vector<16x64xf32>, vector<16x64xf32> -> vector<16x64xf32>
    %c0_37 = arith.constant 0 : index
    %c0_38 = arith.constant 0 : index
    %c6 = arith.constant 6 : index
    %c0_39 = arith.constant 0 : index
    %45 = vector.load %arg7[%c0_37, %c0_38, %c6, %c0_39] : memref<1x16x16x64xf32, #tpu.memory_space<vmem>>, vector<1x16x1x64xf32>
    %46 = vector.shape_cast %45 : vector<1x16x1x64xf32> to vector<16x64xf32>
    %47 = vector.shape_cast %44 : vector<16x64xf32> to vector<1x16x1x64xf32>
    tpu.vector_store %arg7[%c0_37, %c0_38, %c6, %c0_39], %47 {strides = array<i32>} : memref<1x16x16x64xf32, #tpu.memory_space<vmem>>, vector<1x16x1x64xf32>,
    %48 = vector.extract_strided_slice %11 {offsets = [0, 112], sizes = [16, 16], strides = [1, 1]} : vector<16x256xf32> to vector<16x16xf32>
    %cst_40 = arith.constant dense<0.000000e+00> : vector<16x64xf32>
    %49 = tpu.matmul %48, %12, %cst_40 {dimension_numbers = #tpu.dot_dimension_numbers<[1], [0], [0], [1], [0, 0, 1, 1], [], []>} : vector<16x16xf32>, vector<16x64xf32>, vector<16x64xf32> -> vector<16x64xf32>
    %c0_41 = arith.constant 0 : index
    %c0_42 = arith.constant 0 : index
    %c7 = arith.constant 7 : index
    %c0_43 = arith.constant 0 : index
    %50 = vector.load %arg7[%c0_41, %c0_42, %c7, %c0_43] : memref<1x16x16x64xf32, #tpu.memory_space<vmem>>, vector<1x16x1x64xf32>
    %51 = vector.shape_cast %50 : vector<1x16x1x64xf32> to vector<16x64xf32>
    %52 = vector.shape_cast %49 : vector<16x64xf32> to vector<1x16x1x64xf32>
    tpu.vector_store %arg7[%c0_41, %c0_42, %c7, %c0_43], %52 {strides = array<i32>} : memref<1x16x16x64xf32, #tpu.memory_space<vmem>>, vector<1x16x1x64xf32>,
    %53 = vector.extract_strided_slice %11 {offsets = [0, 128], sizes = [16, 16], strides = [1, 1]} : vector<16x256xf32> to vector<16x16xf32>
    %cst_44 = arith.constant dense<0.000000e+00> : vector<16x64xf32>
    %54 = tpu.matmul %53, %12, %cst_44 {dimension_numbers = #tpu.dot_dimension_numbers<[1], [0], [0], [1], [0, 0, 1, 1], [], []>} : vector<16x16xf32>, vector<16x64xf32>, vector<16x64xf32> -> vector<16x64xf32>
    %c0_45 = arith.constant 0 : index
    %c0_46 = arith.constant 0 : index
    %c8 = arith.constant 8 : index
    %c0_47 = arith.constant 0 : index
    %55 = vector.load %arg7[%c0_45, %c0_46, %c8, %c0_47] : memref<1x16x16x64xf32, #tpu.memory_space<vmem>>, vector<1x16x1x64xf32>
    %56 = vector.shape_cast %55 : vector<1x16x1x64xf32> to vector<16x64xf32>
    %57 = vector.shape_cast %54 : vector<16x64xf32> to vector<1x16x1x64xf32>
    tpu.vector_store %arg7[%c0_45, %c0_46, %c8, %c0_47], %57 {strides = array<i32>} : memref<1x16x16x64xf32, #tpu.memory_space<vmem>>, vector<1x16x1x64xf32>,
    %58 = vector.extract_strided_slice %11 {offsets = [0, 144], sizes = [16, 16], strides = [1, 1]} : vector<16x256xf32> to vector<16x16xf32>
    %cst_48 = arith.constant dense<0.000000e+00> : vector<16x64xf32>
    %59 = tpu.matmul %58, %12, %cst_48 {dimension_numbers = #tpu.dot_dimension_numbers<[1], [0], [0], [1], [0, 0, 1, 1], [], []>} : vector<16x16xf32>, vector<16x64xf32>, vector<16x64xf32> -> vector<16x64xf32>
    %c0_49 = arith.constant 0 : index
    %c0_50 = arith.constant 0 : index
    %c9 = arith.constant 9 : index
    %c0_51 = arith.constant 0 : index
    %60 = vector.load %arg7[%c0_49, %c0_50, %c9, %c0_51] : memref<1x16x16x64xf32, #tpu.memory_space<vmem>>, vector<1x16x1x64xf32>
    %61 = vector.shape_cast %60 : vector<1x16x1x64xf32> to vector<16x64xf32>
    %62 = vector.shape_cast %59 : vector<16x64xf32> to vector<1x16x1x64xf32>
    tpu.vector_store %arg7[%c0_49, %c0_50, %c9, %c0_51], %62 {strides = array<i32>} : memref<1x16x16x64xf32, #tpu.memory_space<vmem>>, vector<1x16x1x64xf32>,
    %63 = vector.extract_strided_slice %11 {offsets = [0, 160], sizes = [16, 16], strides = [1, 1]} : vector<16x256xf32> to vector<16x16xf32>
    %cst_52 = arith.constant dense<0.000000e+00> : vector<16x64xf32>
    %64 = tpu.matmul %63, %12, %cst_52 {dimension_numbers = #tpu.dot_dimension_numbers<[1], [0], [0], [1], [0, 0, 1, 1], [], []>} : vector<16x16xf32>, vector<16x64xf32>, vector<16x64xf32> -> vector<16x64xf32>
    %c0_53 = arith.constant 0 : index
    %c0_54 = arith.constant 0 : index
    %c10 = arith.constant 10 : index
    %c0_55 = arith.constant 0 : index
    %65 = vector.load %arg7[%c0_53, %c0_54, %c10, %c0_55] : memref<1x16x16x64xf32, #tpu.memory_space<vmem>>, vector<1x16x1x64xf32>
    %66 = vector.shape_cast %65 : vector<1x16x1x64xf32> to vector<16x64xf32>
    %67 = vector.shape_cast %64 : vector<16x64xf32> to vector<1x16x1x64xf32>
    tpu.vector_store %arg7[%c0_53, %c0_54, %c10, %c0_55], %67 {strides = array<i32>} : memref<1x16x16x64xf32, #tpu.memory_space<vmem>>, vector<1x16x1x64xf32>,
    %68 = vector.extract_strided_slice %11 {offsets = [0, 176], sizes = [16, 16], strides = [1, 1]} : vector<16x256xf32> to vector<16x16xf32>
    %cst_56 = arith.constant dense<0.000000e+00> : vector<16x64xf32>
    %69 = tpu.matmul %68, %12, %cst_56 {dimension_numbers = #tpu.dot_dimension_numbers<[1], [0], [0], [1], [0, 0, 1, 1], [], []>} : vector<16x16xf32>, vector<16x64xf32>, vector<16x64xf32> -> vector<16x64xf32>
    %c0_57 = arith.constant 0 : index
    %c0_58 = arith.constant 0 : index
    %c11 = arith.constant 11 : index
    %c0_59 = arith.constant 0 : index
    %70 = vector.load %arg7[%c0_57, %c0_58, %c11, %c0_59] : memref<1x16x16x64xf32, #tpu.memory_space<vmem>>, vector<1x16x1x64xf32>
    %71 = vector.shape_cast %70 : vector<1x16x1x64xf32> to vector<16x64xf32>
    %72 = vector.shape_cast %69 : vector<16x64xf32> to vector<1x16x1x64xf32>
    tpu.vector_store %arg7[%c0_57, %c0_58, %c11, %c0_59], %72 {strides = array<i32>} : memref<1x16x16x64xf32, #tpu.memory_space<vmem>>, vector<1x16x1x64xf32>,
    %73 = vector.extract_strided_slice %11 {offsets = [0, 192], sizes = [16, 16], strides = [1, 1]} : vector<16x256xf32> to vector<16x16xf32>
    %cst_60 = arith.constant dense<0.000000e+00> : vector<16x64xf32>
    %74 = tpu.matmul %73, %12, %cst_60 {dimension_numbers = #tpu.dot_dimension_numbers<[1], [0], [0], [1], [0, 0, 1, 1], [], []>} : vector<16x16xf32>, vector<16x64xf32>, vector<16x64xf32> -> vector<16x64xf32>
    %c0_61 = arith.constant 0 : index
    %c0_62 = arith.constant 0 : index
    %c12 = arith.constant 12 : index
    %c0_63 = arith.constant 0 : index
    %75 = vector.load %arg7[%c0_61, %c0_62, %c12, %c0_63] : memref<1x16x16x64xf32, #tpu.memory_space<vmem>>, vector<1x16x1x64xf32>
    %76 = vector.shape_cast %75 : vector<1x16x1x64xf32> to vector<16x64xf32>
    %77 = vector.shape_cast %74 : vector<16x64xf32> to vector<1x16x1x64xf32>
    tpu.vector_store %arg7[%c0_61, %c0_62, %c12, %c0_63], %77 {strides = array<i32>} : memref<1x16x16x64xf32, #tpu.memory_space<vmem>>, vector<1x16x1x64xf32>,
    %78 = vector.extract_strided_slice %11 {offsets = [0, 208], sizes = [16, 16], strides = [1, 1]} : vector<16x256xf32> to vector<16x16xf32>
    %cst_64 = arith.constant dense<0.000000e+00> : vector<16x64xf32>
    %79 = tpu.matmul %78, %12, %cst_64 {dimension_numbers = #tpu.dot_dimension_numbers<[1], [0], [0], [1], [0, 0, 1, 1], [], []>} : vector<16x16xf32>, vector<16x64xf32>, vector<16x64xf32> -> vector<16x64xf32>
    %c0_65 = arith.constant 0 : index
    %c0_66 = arith.constant 0 : index
    %c13 = arith.constant 13 : index
    %c0_67 = arith.constant 0 : index
    %80 = vector.load %arg7[%c0_65, %c0_66, %c13, %c0_67] : memref<1x16x16x64xf32, #tpu.memory_space<vmem>>, vector<1x16x1x64xf32>
    %81 = vector.shape_cast %80 : vector<1x16x1x64xf32> to vector<16x64xf32>
    %82 = vector.shape_cast %79 : vector<16x64xf32> to vector<1x16x1x64xf32>
    tpu.vector_store %arg7[%c0_65, %c0_66, %c13, %c0_67], %82 {strides = array<i32>} : memref<1x16x16x64xf32, #tpu.memory_space<vmem>>, vector<1x16x1x64xf32>,
    %83 = vector.extract_strided_slice %11 {offsets = [0, 224], sizes = [16, 16], strides = [1, 1]} : vector<16x256xf32> to vector<16x16xf32>
    %cst_68 = arith.constant dense<0.000000e+00> : vector<16x64xf32>
    %84 = tpu.matmul %83, %12, %cst_68 {dimension_numbers = #tpu.dot_dimension_numbers<[1], [0], [0], [1], [0, 0, 1, 1], [], []>} : vector<16x16xf32>, vector<16x64xf32>, vector<16x64xf32> -> vector<16x64xf32>
    %c0_69 = arith.constant 0 : index
    %c0_70 = arith.constant 0 : index
    %c14 = arith.constant 14 : index
    %c0_71 = arith.constant 0 : index
    %85 = vector.load %arg7[%c0_69, %c0_70, %c14, %c0_71] : memref<1x16x16x64xf32, #tpu.memory_space<vmem>>, vector<1x16x1x64xf32>
    %86 = vector.shape_cast %85 : vector<1x16x1x64xf32> to vector<16x64xf32>
    %87 = vector.shape_cast %84 : vector<16x64xf32> to vector<1x16x1x64xf32>
    tpu.vector_store %arg7[%c0_69, %c0_70, %c14, %c0_71], %87 {strides = array<i32>} : memref<1x16x16x64xf32, #tpu.memory_space<vmem>>, vector<1x16x1x64xf32>,
    %88 = vector.extract_strided_slice %11 {offsets = [0, 240], sizes = [16, 16], strides = [1, 1]} : vector<16x256xf32> to vector<16x16xf32>
    %cst_72 = arith.constant dense<0.000000e+00> : vector<16x64xf32>
    %89 = tpu.matmul %88, %12, %cst_72 {dimension_numbers = #tpu.dot_dimension_numbers<[1], [0], [0], [1], [0, 0, 1, 1], [], []>} : vector<16x16xf32>, vector<16x64xf32>, vector<16x64xf32> -> vector<16x64xf32>
    %c0_73 = arith.constant 0 : index
    %c0_74 = arith.constant 0 : index
    %c15 = arith.constant 15 : index
    %c0_75 = arith.constant 0 : index
    %90 = vector.load %arg7[%c0_73, %c0_74, %c15, %c0_75] : memref<1x16x16x64xf32, #tpu.memory_space<vmem>>, vector<1x16x1x64xf32>
    %91 = vector.shape_cast %90 : vector<1x16x1x64xf32> to vector<16x64xf32>
    %92 = vector.shape_cast %89 : vector<16x64xf32> to vector<1x16x1x64xf32>
    tpu.vector_store %arg7[%c0_73, %c0_74, %c15, %c0_75], %92 {strides = array<i32>} : memref<1x16x16x64xf32, #tpu.memory_space<vmem>>, vector<1x16x1x64xf32>,
    return
  }
  func.func @transform_0(%arg0: i32, %arg1: i32) -> (i32, i32, i32) {
    %c0_i32 = arith.constant 0 : i32
    %c0_i32_0 = arith.constant 0 : i32
    return %arg0, %c0_i32, %arg1 : i32, i32, i32
  }
  func.func @transform_1(%arg0: i32, %arg1: i32) -> (i32, i32) {
    %c0_i32 = arith.constant 0 : i32
    %c0_i32_0 = arith.constant 0 : i32
    %c0_i32_1 = arith.constant 0 : i32
    return %c0_i32, %c0_i32_0 : i32, i32
  }
  func.func @transform_2(%arg0: i32, %arg1: i32) -> (i32, i32) {
    %c0_i32 = arith.constant 0 : i32
    %c0_i32_0 = arith.constant 0 : i32
    %c0_i32_1 = arith.constant 0 : i32
    return %c0_i32, %c0_i32_0 : i32, i32
  }
  func.func @transform_3(%arg0: i32, %arg1: i32) -> (i32, i32) {
    %c0_i32 = arith.constant 0 : i32
    %c0_i32_0 = arith.constant 0 : i32
    %c0_i32_1 = arith.constant 0 : i32
    return %c0_i32, %c0_i32_0 : i32, i32
  }
  func.func @transform_4(%arg0: i32, %arg1: i32) -> (i32, i32) {
    %c0_i32 = arith.constant 0 : i32
    %c0_i32_0 = arith.constant 0 : i32
    %c0_i32_1 = arith.constant 0 : i32
    return %c0_i32, %c0_i32_0 : i32, i32
  }
  func.func @transform_5(%arg0: i32, %arg1: i32) -> (i32, i32, i32, i32) {
    %c0_i32 = arith.constant 0 : i32
    %c0_i32_0 = arith.constant 0 : i32
    %c0_i32_1 = arith.constant 0 : i32
    return %arg0, %c0_i32, %arg1, %c0_i32_0 : i32, i32, i32, i32
  }
}

</mosaic_0001>

<bundles_post_ra>
// kernel: tpu_custom_call.1
= control target key start
LH: loop header
LB: loop body
LE: loop exit
PB: predicated region body
PF: predicated region fallthrough
CT: control target
= control target key end

     0   :  { %10 = vsyncpa [#allocation3], 0  ;;  %s5663_s0 = inlined_call_operand.hbm [shape: f32[2,32,256], index: 0, kind: input, shape index: {}]   ;;  %s5664_s1 = inlined_call_operand.vmem [shape: f32[32,1], index: 1, kind: input, shape index: {}]   ;;  %s5665_s2 = inlined_call_operand.vmem [shape: f32[32,1], index: 2, kind: input, shape index: {}]   ;;  %s5666_s3 = inlined_call_operand.vmem [shape: f32[16,32], index: 3, kind: input, shape index: {}]   ;;  %s5667_s4 = inlined_call_operand.vmem [shape: f32[16,64], index: 4, kind: input, shape index: {}]   ;;  %s5668_s5 = inlined_call_operand.hbm [shape: f32[2,16,16,64], index: 5, kind: output, shape index: {}]  }
   0x1   :  { %12 = vsyncpa [#allocation3 + $0x1], 0 }
   0x2   :  { %13 = vsyncpa [#allocation4], 0 }
   0x3   :  { %15 = vsyncpa [#allocation4 + $0x1], 0  ;;  %s4509_s18 = smov 0   ;;  %s4511_s19 = smov 0  }
   0x4   :  { %s4513_s20 = smov 0   ;;  %s4515_s21 = smov 0  }
   0x5   :  { %s4517_s22 = smov 0   ;;  %s4519_s23 = smov 0  }
   0x6 LB: > { %s3972_s24 = sadd.s32 4294967295, %s4461_s23   ;;  %s3973_s25 = sadd.s32 4294967294, %s4461_s23   ;;  %s4461_s23 = sphi %s4519_s23, %s21_s23   ;;  %s4457_s22 = sphi %s4517_s22, %s5683_s22   ;;  %s4453_s21 = sphi %s4515_s21, %s5682_s21   ;;  %s4449_s20 = sphi %s4513_s20, %s5681_s20   ;;  %s4445_s19 = sphi %s4511_s19, %s5680_s19   ;;  %s4441_s18 = sphi %s4509_s18, %s5679_s18  }
   0x7   : > { %s33_s26 = sadd.s32 1, %s4457_s22  ;;  %s42_s27 = sadd.s32 1, %s4449_s20 }
   0x8   : > { %p35_p0 = scmp.ge.s32.totalorder %s33_s26, 2  ;;  %p49_p1 = scmp.ne.s32.totalorder %s4449_s20, %s4445_s19 }
   0x9   : > { %p50_p2 = scmp.eq.s32.totalorder %s4461_s23, 0  ;;  %p55_p3 = scmp.ne.s32.totalorder %s4445_s19, %s4441_s18 }
   0xa   : > { %s5685_s26 = smov (%p35_p0, %s33_s26), 0  ;;  %p56_p5 = scmp.eq.s32.totalorder %s3972_s24, 0 }
   0xb   : > { %p4550_p4 = por %p50_p2, %p49_p1  ;;  %s37_s29 = ssub.s32 %s4457_s22, %s5685_s26 }
   0xc   : > { %p165_p6 = scmp.eq.s32.totalorder %s3972_s24, 1  ;;  %p40_p7 = scmp.eq.s32.totalorder %s37_s29, 0 }
   0xd   : > { %p4556_p8 = por %p56_p5, %p55_p3  ;;  %p171_p10 = scmp.eq.s32.totalorder %s3973_s25, 1 }
   0xe   : > { %p4560_p9 = por %p165_p6, %p49_p1  ;;  %p4283_p13 = scmp.lt.s32.totalorder %s4461_s23, 2 }
   0xf   : > { %s4565_s7 = scalar_select %p40_p7, %s4449_s20, %s42_s27  }
  0x10   : > { %s5672_s6 = scalar_select %p4560_p9, 1, 0 }
  0x11   : > { %p4567_p11 = por %p171_p10, %p55_p3  ;;  %s203_s9 = sand.u32 1, %s4449_s20  }
  0x12   : > { %s3976_s10 = sshll.u32 %s203_s9, 6  ;;  %s4021_s11 = sshll.u32 %s4457_s22, 10 }
  0x13   : > { %s5673_s8 = scalar_select %p4567_p11, 1, 0 }
  0x14   : > { %s4578_s14 = scalar_lea.hbm %s5663_s0, %s4021_s11  ;;  %s207_s15 = scalar_lea.vmem [#allocation2], %s3976_s10 }
  0x15   : > { %s216_s16 = sshll.u32 %s207_s15, 4  ;;  %p4584_p0 = pnand %p4283_p13, %p4550_p4  ;;  %s4580_s16 = int_to_ptr.vmem [resolvable:$true] %s216_s16 }
  0x16   : > { %s4589_s24 = scalar_lea.sflag [#allocation3], %s203_s9  ;;  %s4349_s25 = scalar_lea.hbm %s4578_s14, 1024 }
  0x17   : > { %p4350_p2 = scmp.ne.s32.totalorder %s4578_s14, %s4349_s25  ;;  %p4351_p3 = pneg %p4584_p0 }
  0x18   : > { %s4354_s28 = scalar_lea.hbm %s5663_s0, 2048  ;;  %p4355_p4 = scmp.lt.u32.totalorder %s4578_s14, %s5663_s0 }
  0x19   : > { %p4352_p5 = pnand %p4351_p3, %p4350_p2  ;;  %p4356_p7 = scmp.lt.u32.totalorder %s4354_s28, %s4349_s25 }
  0x1a   : > { %p4358_p13 = scmp.lt.u32.totalorder %s4349_s25, %s4578_s14 }
  0x1b   : > { %p4353_p6 = pneg %p4352_p5  ;;  %p4357_p10 = por %p4356_p7, %p4355_p4 }
  0x1d   : > { %p4359_p12 = por %p4358_p13, %p4357_p10 }
  0x1f   : > { %p4360_p1 = pnand %p4359_p12, %p4353_p6 }
  0x21   : > { %4363 = shalt.err (!%p4360_p1)
}
  0x22   : > { %s4364_s9 = scalar_lea.vmem %s4580_s16, 1024  ;;  %s4463_s12 = smov [#allocation2]  }
  0x23   : > { %p4365_p2 = scmp.ne.s32.totalorder %s4580_s16, %s4364_s9  ;;  %s4369_s13 = sshll.u32 %s4463_s12, 4  ;;  %s4370_s13 = int_to_ptr.vmem [resolvable:$false] %s4369_s13 }
  0x24   : > { %s4371_s15 = scalar_lea.vmem %s4370_s13, 2048  ;;  %p4372_p9 = scmp.lt.s32.totalorder %s4580_s16, %s4370_s13 }
  0x25   : > { %p4367_p5 = pnand %p4365_p2, %p4351_p3  ;;  %p4373_p4 = scmp.lt.s32.totalorder %s4371_s15, %s4364_s9 }
  0x27   : > { %p4368_p11 = pneg %p4367_p5  ;;  %p4374_p7 = por %p4373_p4, %p4372_p9 }
  0x29   : > { %p4375_p10 = pnand %p4374_p7, %p4368_p11 }
  0x2b   : > { %4378 = shalt.err (!%p4375_p10)
}
  0x2c   : > { %s4464_s25 = smov 256   ;;  %s4465_s27 = smov 16  }
  0x2d   : > { %4278 = dma.hbm_to_vmem [thread:$0]  (!%p4584_p0), %s4578_s14, 1024, %s4580_s16, %s4589_s24, %s4464_s25, %s4464_s25, %s4465_s27  }
  0x2e   : > { %p224_p12 = scmp.lt.s32.totalorder %s4461_s23, 3  ;;  %p5675_p1 = scmp.ge.s32.totalorder %s4461_s23, 1 }
  0x30   : > { %p225_p3 = pnand %p5675_p1, %p224_p12 }
  0x31   : > { %s4621_s29 = sand.u32 (!%p225_p3), 1, %s4445_s19  }
  0x32   : > { %228 = sbr.rel (%p225_p3) target bundleno = 914 (0x392), region = 40  ;;  %s3980_s28 = sshll.u32 (!%p225_p3), %s4621_s29, 6 }
  0x33   : > { %s231_s10 = scalar_lea.sflag (!%p225_p3), [#allocation3], %s4621_s29  ;;  %s4625_s11 = scalar_lea.vmem (!%p225_p3), [#allocation2], %s3980_s28 }
  0x39   : > { %4432 = dma.done.wait (%p4556_p8), %s231_s10, 1024  }
  0x3a   : > { %4434 = vsyncadd (%p4556_p8), %s231_s10, 4294966272  ;;  %v4466_v0 = vmov 0   ;;  %v303_v1 = vld [vmem:[%s5665_s2] sm:$0xff]  ;;  %v304_v3 = vld [vmem:[%s5665_s2 + $0x8] sm:$0xff]  ;;  %v4467_v9 = vmov 0.0   ;;  %vm345_vm0 = vcmask 261120  }
  0x3b   : > { %4348 = vset.pattern.permute.xlu1 %v4466_v0  ;;  %4347 = vset.pattern.permute.xlu0 %v4466_v0  ;;  %v271_v2 = vld [vmem:[%s5664_s1] sm:$0xff]  ;;  %v272_v4 = vld [vmem:[%s5664_s1 + $0x8] sm:$0xff]  ;;  %v274_v5 = vld [vmem:[%s5664_s1 + $0x18] sm:$0xff]  ;;  %vm431_vm1 = vcmask 130048   ;;  %s4468_s27 = smov 80   ;;  %s4469_s28 = smov 112  }
  0x3c   : > { %309 = vperm.xlu1 %4348, %v303_v1   ;;  %277 = vperm.xlu0 %4347, %v271_v2   ;;  %v273_v6 = vld [vmem:[%s5664_s1 + $0x10] sm:$0xff]  ;;  %v306_v7 = vld [vmem:[%s5665_s2 + $0x18] sm:$0xff]  ;;  %v263_v10 = vld [vmem:[%s4625_s11] sm:$0xff]  ;;  %s4470_s10 = smov 48   ;;  %s4471_s14 = smov 96   ;;  %vm629_vm2 = vcmask 516096  }
  0x3d   : > { %v305_v8 = vld [vmem:[%s5665_s2 + $0x10] sm:$0xff]  ;;  %416 = vmatprep.mubr.f32.mxu0 %v4467_v9  ;;  %v264_v11 = vld [vmem:[%s4625_s11 + $0x8] sm:$0xff]  ;;  %v266_v17 = vld [vmem:[%s4625_s11 + $0x18] sm:$0xff]  ;;  %s4472_s16 = smov 16   ;;  %s4473_s17 = smov 64  }
  0x3e   : > { %v265_v16 = vld [vmem:[%s4625_s11 + $0x10] sm:$0xff]  ;;  %v270_v28 = vld [vmem:[%s4625_s11 + $0x38] sm:$0xff]  ;;  %v267_v30 = vld [vmem:[%s4625_s11 + $0x20] sm:$0xff]  ;;  %s3981_s24 = sshll.u32 %s4621_s29, 8  ;;  %s4022_s12 = sshll.u32 %s4453_s21, 12 }
  0x3f   : > { %v269_v25 = vld [vmem:[%s4625_s11 + $0x30] sm:$0xff]  ;;  %v268_v31 = vld [vmem:[%s4625_s11 + $0x28] sm:$0xff]  ;;  %v343_v54 = vld [vmem:[%s5666_s3] sm:$0xff]  ;;  %s4474_s11 = smov 32   ;;  %s4784_s9 = scalar_lea.vmem [#allocation5], %s3981_s24 }
  0x40   : > { %314 = vperm.xlu1 %4348, %v304_v3   ;;  %282 = vperm.xlu0 %4347, %v272_v4   ;;  %v344_v55 = vld [vmem:[%s5666_s3 + $0x8] sm:$0xff]  ;;  %v429_v56 = vld [vmem:[%s5667_s4] sm:$0xff]  ;;  %s3885_s30 = sshll.u32 %s4784_s9, 4  ;;  %s5604_s15 = scalar_lea.hbm %s5668_s5, %s4022_s12  ;;  %s5606_s30 = int_to_ptr.vmem [resolvable:$true] %s3885_s30 }
  0x41   : > { %v430_v57 = vld [vmem:[%s5667_s4 + $0x8] sm:$0xff]  ;;  %s3870_s25 = scalar_lea.sflag [#allocation4], %s4621_s29  ;;  %p5676_p9 = scmp.ne.s32.totalorder %s5672_s6, 0 }
  0x42   : > { %v4675_v58 = vpack.c.bf16 %v430_v57, %v429_v56 }
  0x44   : > { %292 = vperm.xlu1 %4348, %v274_v5   ;;  %287 = vperm.xlu0 %4347, %v273_v6  }
  0x45   : > { %4208 = vmatprep.subr.bf16.mxu1 %v4675_v58 }
  0x46   : > { %4210 = vmatpush3.bf16.msra.mxu1 %v4675_v58 }
  0x47   : > { %4212 = vmatprep.subr.bf16.mxu1 %v4675_v58 }
  0x48   : > { %324 = vperm.xlu1 %4348, %v306_v7   ;;  %319 = vperm.xlu0 %4347, %v305_v8  }
  0xbb   : > { %v310_v12 = vpop.permute.xlu1 %309  ;;  %v278_v13 = vpop.permute.xlu0 %277 }
  0xbc   : > { %v295_v14 = vmul.f32 %v278_v13, %v263_v10  ;;  %v296_v15 = vmul.f32 %v278_v13, %v264_v11 }
  0xbe   : > { %v327_v22 = vadd.f32 %v310_v12, %v295_v14  ;;  %v328_v23 = vadd.f32 %v310_v12, %v296_v15 }
  0xbf   : > { %v315_v18 = vpop.permute.xlu1 %314  ;;  %v283_v19 = vpop.permute.xlu0 %282 }
  0xc0   : > { %v297_v20 = vmul.f32 %v283_v19, %v265_v16  ;;  %v298_v21 = vmul.f32 %v283_v19, %v266_v17  ;;  %v336_v32 = vmax.f32 %v328_v23, 0.0  ;;  %v335_v34 = vmax.f32 %v327_v22, 0.0 }
  0xc2   : > { %v329_v24 = vadd.f32 %v315_v18, %v297_v20  ;;  %v330_v26 = vadd.f32 %v315_v18, %v298_v21 }
  0xc3   : > { %v293_v27 = vpop.permute.xlu1 %292  ;;  %v288_v29 = vpop.permute.xlu0 %287 }
  0xc4   : > { %v338_v33 = vmax.f32 %v330_v26, 0.0  ;;  %v337_v35 = vmax.f32 %v329_v24, 0.0  ;;  %v301_v36 = vmul.f32 %v293_v27, %v269_v25  ;;  %v302_v37 = vmul.f32 %v293_v27, %v270_v28 }
  0xc5   : > { %v299_v38 = vmul.f32 %v288_v29, %v267_v30  ;;  %v300_v39 = vmul.f32 %v288_v29, %v268_v31  ;;  %v4475_v27 = vmov 1966171168   ;;  %v519_v29 = vlaneseq }
  0xc6   : > { %v4199_v42 = vpack.c.bf16 %v338_v33, %v336_v32  ;;  %v4201_v43 = vpack.c.bf16 %v337_v35, %v335_v34  ;;  %v517_v28 = vunpack.c.l.s4 %v4475_v27 }
  0xc7   : > { %v325_v40 = vpop.permute.xlu1 %324  ;;  %v320_v41 = vpop.permute.xlu0 %319  ;;  %v520_v31 = vshrl.u32 %v519_v29, 7 }
  0xc8   : > { %v333_v44 = vadd.f32 %v325_v40, %v301_v36  ;;  %v334_v45 = vadd.f32 %v325_v40, %v302_v37  ;;  %v331_v46 = vadd.f32 %v320_v41, %v299_v38  ;;  %v332_v47 = vadd.f32 %v320_v41, %v300_v39  ;;  %4200 = vmatprep.subr.bf16.mxu0 %v4199_v42 }
  0xc9   : > { %4202 = vmatpush1.bf16.msra.mxu0 %v4201_v43  ;;  %v518_v30 = vunpack.c.0.s8 %v517_v28 }
  0xca   : > { %v341_v48 = vmax.f32 %v333_v44, 0.0  ;;  %v342_v49 = vmax.f32 %v334_v45, 0.0  ;;  %v339_v50 = vmax.f32 %v331_v46, 0.0  ;;  %v340_v51 = vmax.f32 %v332_v47, 0.0 }
  0xcb   : > { %v4773_v32 = vsub.s32 %v518_v30, %v520_v31 }
  0xcc   : > { %v4203_v52 = vpack.c.bf16 %v342_v49, %v340_v51  ;;  %v4205_v53 = vpack.c.bf16 %v341_v48, %v339_v50 }
  0xce   : > { %4204 = vmatprep.subr.bf16.mxu0 %v4203_v52 }
  0xcf   : > { %4206 = vmatpush1.bf16.msra.mxu0 %v4205_v53 }
  0xd0   : > { %4220 = vmatprep.subr.bf16.mxu0 %v4675_v58 }
  0xd2   : > { %3982 = vmatmul.mubr.msk.f32.vlgmr.msra.gmra.mrb[0].mxu0 %vm345_vm0, %v343_v54 }
  0xd3   : > { %422 = vmatprep.mubr.f32.mxu0 %v4467_v9  ;;  %4222 = vmatpush3.bf16.msra.mxu0 %v4675_v58 }
  0xd4   : > { %4228 = vmatprep.subr.bf16.mxu0 %v4675_v58 }
  0xd6   : > { %3983 = vmatmul.mubr.msk.f32.gmra.mrb[2].mxu0 %vm345_vm0, %v344_v55 }
 0x1a5   : > { %v418_v59 = vpop.f32.mrb[0].mxu0 }
 0x1a6   : > { %1076 = vrot.lane.b32.xlu1 %v418_v59, %s4468_s27  ;;  %646 = vrot.lane.b32.xlu0 %v418_v59, %s4469_s28  ;;  %v4685_v60 = vpop.f32.mrb[1].mxu0 }
 0x1a7   : > { %4091 = vmatprep.mubr.msk.f32.mxu1 %vm431_vm1, %v418_v59 }
 0x1a9   : > { %v424_v61 = vpop.f32.mrb[2].mxu0 }
 0x1aa   : > { %1506 = vrot.lane.b32.xlu1 %v418_v59, %s4470_s10  ;;  %861 = vrot.lane.b32.xlu0 %v418_v59, %s4471_s14  ;;  %v4689_v62 = vpop.f32.mrb[3].mxu0 }
 0x1ab   : > { %4092 = vmatmul.mubr.msk.f32.vlgmr.msra.gmra.mrb[0].mxu1 %vm431_vm1, %v424_v61 }
 0x1ac   : > { %4214 = vmatpush3.bf16.msra.mxu1 %v4675_v58 }
 0x1ad   : > { %4216 = vmatprep.subr.bf16.mxu1 %v4675_v58 }
 0x1ae   : > { %1936 = vrot.lane.b32.xlu1 %v418_v59, %s4472_s16  ;;  %1291 = vrot.lane.b32.xlu0 %v418_v59, %s4473_s17 }
 0x1b2   : > { %1721 = vrot.lane.b32.xlu0 %v418_v59, %s4474_s11  ;;  %2794 = vrot.lane.b32.xlu1 %v4685_v60, %s4468_s27 }
 0x1b6   : > { %3224 = vrot.lane.b32.xlu1 %v4685_v60, %s4470_s10  ;;  %2364 = vrot.lane.b32.xlu0 %v4685_v60, %s4469_s28 }
 0x1ba   : > { %2579 = vrot.lane.b32.xlu0 %v4685_v60, %s4471_s14  ;;  %648 = vrot.lane.b32.xlu1 %v424_v61, %s4469_s28 }
 0x1be   : > { %3009 = vrot.lane.b32.xlu0 %v4685_v60, %s4473_s17  ;;  %1078 = vrot.lane.b32.xlu1 %v424_v61, %s4468_s27 }
 0x1c2   : > { %863 = vrot.lane.b32.xlu0 %v424_v61, %s4471_s14  ;;  %1508 = vrot.lane.b32.xlu1 %v424_v61, %s4470_s10 }
 0x1c6   : > { %1293 = vrot.lane.b32.xlu0 %v424_v61, %s4473_s17  ;;  %3654 = vrot.lane.b32.xlu1 %v4685_v60, %s4472_s16 }
 0x1ca   : > { %1723 = vrot.lane.b32.xlu0 %v424_v61, %s4474_s11  ;;  %1938 = vrot.lane.b32.xlu1 %v424_v61, %s4472_s16 }
 0x1ce   : > { %3439 = vrot.lane.b32.xlu0 %v4685_v60, %s4474_s11  ;;  %2366 = vrot.lane.b32.xlu1 %v4689_v62, %s4469_s28  ;;  %s4476_s28 = smov [#allocation5]  }
 0x1d2   : > { %2581 = vrot.lane.b32.xlu0 %v4689_v62, %s4471_s14  ;;  %2796 = vrot.lane.b32.xlu1 %v4689_v62, %s4468_s27  ;;  %s4379_s27 = scalar_lea.vmem %s5606_s30, 4096 }
 0x1d3   : > { %p4380_p8 = scmp.ne.s32.totalorder %s5606_s30, %s4379_s27 }
 0x1d5   : > { %p4381_p11 = pnand %p4380_p8, %p5676_p9 }
 0x1d6   : > { %3011 = vrot.lane.b32.xlu0 %v4689_v62, %s4473_s17  ;;  %3226 = vrot.lane.b32.xlu1 %v4689_v62, %s4470_s10  ;;  %s4383_s10 = sshll.u32 %s4476_s28, 4  ;;  %s4384_s10 = int_to_ptr.vmem [resolvable:$false] %s4383_s10 }
 0x1d7   : > { %p4382_p0 = pneg %p4381_p11  ;;  %s4385_s14 = scalar_lea.vmem %s4384_s10, 8192 }
 0x1d8   : > { %p4386_p6 = scmp.lt.s32.totalorder %s5606_s30, %s4384_s10  ;;  %p4387_p13 = scmp.lt.s32.totalorder %s4385_s14, %s4379_s27 }
 0x1da   : > { %3441 = vrot.lane.b32.xlu0 %v4689_v62, %s4474_s11  ;;  %3656 = vrot.lane.b32.xlu1 %v4689_v62, %s4472_s16  ;;  %p4388_p2 = por %p4387_p13, %p4386_p6 }
 0x1dc   : > { %p4389_p5 = pnand %p4388_p2, %p4382_p0 }
 0x218   : > { %v1077_v63 = vpop.permute.xlu1 %1076  ;;  %v647_v0 = vpop.permute.xlu0 %646 }
 0x219   : > { %4098 = vmatprep.mubr.msk.f32.mxu1 %vm431_vm1, %v647_v0  ;;  %4112 = vmatprep.mubr.msk.f32.mxu0 %vm431_vm1, %v1077_v63 }
 0x21c   : > { %v1507_v1 = vpop.permute.xlu1 %1506  ;;  %v862_v2 = vpop.permute.xlu0 %861 }
 0x220   : > { %v1937_v3 = vpop.permute.xlu1 %1936  ;;  %v1292_v4 = vpop.permute.xlu0 %1291 }
 0x224   : > { %v1722_v5 = vpop.permute.xlu0 %1721  ;;  %v2795_v6 = vpop.permute.xlu1 %2794 }
 0x228   : > { %v3225_v7 = vpop.permute.xlu1 %3224  ;;  %v2365_v8 = vpop.permute.xlu0 %2364 }
 0x22c   : > { %v2580_v9 = vpop.permute.xlu0 %2579  ;;  %v649_v10 = vpop.permute.xlu1 %648 }
 0x22d   : > { %4099 = vmatmul.mubr.msk.f32.vlgmr.msra.gmra.mrb[2].mxu1 %vm431_vm1, %v649_v10 }
 0x22e   : > { %4105 = vmatprep.mubr.msk.f32.mxu1 %vm431_vm1, %v862_v2  ;;  %4218 = vmatpush3.bf16.msra.mxu1 %v4675_v58 }
 0x22f   : > { %4224 = vmatprep.subr.bf16.mxu1 %v4675_v58 }
 0x230   : > { %v3010_v11 = vpop.permute.xlu0 %3009  ;;  %v1079_v12 = vpop.permute.xlu1 %1078 }
 0x231   : > { %4113 = vmatmul.mubr.msk.f32.vlgmr.msra.gmra.mrb[4].mxu0 %vm431_vm1, %v1079_v12 }
 0x232   : > { %4230 = vmatpush3.bf16.msra.mxu0 %v4675_v58  ;;  %4126 = vmatprep.mubr.msk.f32.mxu0 %vm431_vm1, %v1507_v1 }
 0x233   : > { %4236 = vmatprep.subr.bf16.mxu0 %v4675_v58 }
 0x234   : > { %v864_v13 = vpop.permute.xlu0 %863  ;;  %v1509_v14 = vpop.permute.xlu1 %1508 }
 0x235   : > { %4106 = vmatmul.mubr.msk.f32.vlgmr.msra.gmra.mrb[4].mxu1 %vm431_vm1, %v864_v13  ;;  %4127 = vmatmul.mubr.msk.f32.vlgmr.msra.gmra.mrb[6].mxu0 %vm431_vm1, %v1509_v14 }
 0x236   : > { %4226 = vmatpush3.bf16.msra.mxu1 %v4675_v58  ;;  %4119 = vmatprep.mubr.msk.f32.mxu1 %vm431_vm1, %v1292_v4 }
 0x237   : > { %4140 = vmatprep.mubr.msk.f32.mxu0 %vm431_vm1, %v1937_v3  ;;  %4232 = vmatprep.subr.bf16.mxu1 %v4675_v58 }
 0x238   : > { %v1294_v15 = vpop.permute.xlu0 %1293  ;;  %v3655_v16 = vpop.permute.xlu1 %3654  ;;  %4238 = vmatpush3.bf16.msra.mxu0 %v4675_v58 }
 0x239   : > { %4120 = vmatmul.mubr.msk.f32.vlgmr.msra.gmra.mrb[6].mxu1 %vm431_vm1, %v1294_v15  ;;  %4244 = vmatprep.subr.bf16.mxu0 %v4675_v58 }
 0x23a   : > { %4234 = vmatpush3.bf16.msra.mxu1 %v4675_v58  ;;  %4133 = vmatprep.mubr.msk.f32.mxu1 %vm431_vm1, %v1722_v5 }
 0x23b   : > { %4240 = vmatprep.subr.bf16.mxu1 %v4675_v58 }
 0x23c   : > { %v1724_v17 = vpop.permute.xlu0 %1723  ;;  %v1939_v18 = vpop.permute.xlu1 %1938 }
 0x23d   : > { %4134 = vmatmul.mubr.msk.f32.vlgmr.msra.gmra.mrb[8].mxu1 %vm431_vm1, %v1724_v17  ;;  %4141 = vmatmul.mubr.msk.f32.vlgmr.msra.gmra.mrb[8].mxu0 %vm431_vm1, %v1939_v18 }
 0x23e   : > { %4242 = vmatpush3.bf16.msra.mxu1 %v4675_v58  ;;  %4246 = vmatpush3.bf16.msra.mxu0 %v4675_v58 }
 0x23f   : > { %4147 = vmatprep.mubr.msk.f32.mxu1 %vm431_vm1, %v4685_v60  ;;  %4154 = vmatprep.mubr.msk.f32.mxu0 %vm431_vm1, %v2365_v8 }
 0x240   : > { %v3440_v19 = vpop.permute.xlu0 %3439  ;;  %4248 = vmatprep.subr.bf16.mxu1 %v4675_v58  ;;  %4252 = vmatprep.subr.bf16.mxu0 %v4675_v58  ;;  %v2367_v20 = vpop.permute.xlu1 %2366 }
 0x241   : > { %4148 = vmatmul.mubr.msk.f32.vlgmr.msra.gmra.mrb[10].mxu1 %vm431_vm1, %v4689_v62  ;;  %4155 = vmatmul.mubr.msk.f32.vlgmr.msra.gmra.mrb[10].mxu0 %vm431_vm1, %v2367_v20 }
 0x242   : > { %4250 = vmatpush3.bf16.msra.mxu1 %v4675_v58  ;;  %4254 = vmatpush3.bf16.msra.mxu0 %v4675_v58 }
 0x243   : > { %4161 = vmatprep.mubr.msk.f32.mxu1 %vm431_vm1, %v2580_v9  ;;  %4168 = vmatprep.mubr.msk.f32.mxu0 %vm431_vm1, %v2795_v6 }
 0x244   : > { %v2582_v21 = vpop.permute.xlu0 %2581  ;;  %4260 = vmatprep.subr.bf16.mxu0 %v4675_v58  ;;  %v2797_v22 = vpop.permute.xlu1 %2796  ;;  %4256 = vmatprep.subr.bf16.mxu1 %v4675_v58 }
 0x245   : > { %4162 = vmatmul.mubr.msk.f32.vlgmr.msra.gmra.mrb[12].mxu1 %vm431_vm1, %v2582_v21  ;;  %4169 = vmatmul.mubr.msk.f32.vlgmr.msra.gmra.mrb[12].mxu0 %vm431_vm1, %v2797_v22 }
 0x246   : > { %4258 = vmatpush3.bf16.msra.mxu1 %v4675_v58  ;;  %4262 = vmatpush3.bf16.msra.mxu0 %v4675_v58 }
 0x247   : > { %4175 = vmatprep.mubr.msk.f32.mxu1 %vm431_vm1, %v3010_v11  ;;  %4182 = vmatprep.mubr.msk.f32.mxu0 %vm431_vm1, %v3225_v7 }
 0x248   : > { %v3012_v23 = vpop.permute.xlu0 %3011  ;;  %4268 = vmatprep.subr.bf16.mxu0 %v4675_v58  ;;  %v3227_v24 = vpop.permute.xlu1 %3226  ;;  %4264 = vmatprep.subr.bf16.mxu1 %v4675_v58 }
 0x249   : > { %4176 = vmatmul.mubr.msk.f32.vlgmr.msra.gmra.mrb[14].mxu1 %vm431_vm1, %v3012_v23  ;;  %4183 = vmatmul.mubr.msk.f32.vlgmr.msra.gmra.mrb[14].mxu0 %vm431_vm1, %v3227_v24 }
 0x24a   : > { %4266 = vmatpush3.bf16.msra.mxu1 %v4675_v58  ;;  %4270 = vmatpush3.bf16.msra.mxu0 %v4675_v58 }
 0x24b   : > { %4189 = vmatprep.mubr.msk.f32.mxu1 %vm431_vm1, %v3440_v19  ;;  %4196 = vmatprep.mubr.msk.f32.mxu0 %vm431_vm1, %v3655_v16 }
 0x24c   : > { %v3442_v25 = vpop.permute.xlu0 %3441  ;;  %v3657_v26 = vpop.permute.xlu1 %3656 }
 0x24d   : > { %4190 = vmatmul.mubr.msk.f32.vlgmr.msra.gmra.mrb[16].mxu1 %vm431_vm1, %v3442_v25  ;;  %4197 = vmatmul.mubr.msk.f32.vlgmr.msra.gmra.mrb[16].mxu0 %vm431_vm1, %v3657_v26 }
 0x27e   : > { %v4093_v33 = vpop.f32.mrb[0].mxu1 }
 0x27f   : > { %v564_v34 = vcombine.high %v4093_v33, %v4093_v33  ;;  %v571_v35 = vrot.slane %v4093_v33, %v4773_v32  ;;  %v504_v36 = vpop.f32.mrb[1].mxu1 }
 0x280   : > { %v515_v37 = vcombine.high %v504_v36, %v504_v36  ;;  %v522_v38 = vrot.slane %v504_v36, %v4773_v32 }
 0x281   : > { %v578_v39 = vrot.slane %v564_v34, %v4773_v32  ;;  %v579_v40 = vcombine.high %v571_v35, %v571_v35  ;;  %v587_v41 = vrot.slane %v571_v35, %v4773_v32 }
 0x282   : > { %v529_v42 = vrot.slane %v515_v37, %v4773_v32  ;;  %v530_v43 = vcombine.high %v522_v38, %v522_v38  ;;  %v538_v44 = vrot.slane %v522_v38, %v4773_v32 }
 0x283   : > { %v580_v45 = vcombine.high %v578_v39, %v578_v39  ;;  %v594_v46 = vrot.slane %v578_v39, %v4773_v32  ;;  %v601_v47 = vrot.slane %v579_v40, %v4773_v32  ;;  %v609_v48 = vcombine.high %v587_v41, %v587_v41  ;;  %638 = vst.msk [vmem:[%s4784_s9 + $0x80] sm:$0x1] %vm629_vm2, %v587_v41 }
 0x284   : > { %v531_v49 = vcombine.high %v529_v42, %v529_v42  ;;  %v545_v50 = vrot.slane %v529_v42, %v4773_v32  ;;  %v552_v51 = vrot.slane %v530_v43, %v4773_v32  ;;  %v560_v52 = vcombine.high %v538_v44, %v538_v44  ;;  %630 = vst.msk [vmem:[%s4784_s9] sm:$0x1] %vm629_vm2, %v538_v44 }
 0x285   : > { %v608_v53 = vrot.slane %v580_v45, %v4773_v32  ;;  %v610_v54 = vcombine.high %v594_v46, %v594_v46  ;;  %v611_v55 = vcombine.high %v601_v47, %v601_v47  ;;  %639 = vst.msk [vmem:[%s4784_s9 + $0x90] sm:$0x1] %vm629_vm2, %v601_v47  ;;  %640 = vst.msk [vmem:[%s4784_s9 + $0xa0] sm:$0x1] %vm629_vm2, %v609_v48 }
 0x286   : > { %642 = vst.msk [vmem:[%s4784_s9 + $0xc0] sm:$0x1] %vm629_vm2, %v594_v46  ;;  %v559_v56 = vrot.slane %v531_v49, %v4773_v32  ;;  %v561_v57 = vcombine.high %v545_v50, %v545_v50  ;;  %v562_v58 = vcombine.high %v552_v51, %v552_v51  ;;  %631 = vst.msk [vmem:[%s4784_s9 + $0x10] sm:$0x1] %vm629_vm2, %v552_v51 }
 0x287   : > { %632 = vst.msk [vmem:[%s4784_s9 + $0x20] sm:$0x1] %vm629_vm2, %v560_v52  ;;  %634 = vst.msk [vmem:[%s4784_s9 + $0x40] sm:$0x1] %vm629_vm2, %v545_v50  ;;  %v612_v59 = vcombine.high %v608_v53, %v608_v53 }
 0x288   : > { %641 = vst.msk [vmem:[%s4784_s9 + $0xb0] sm:$0x1] %vm629_vm2, %v611_v55  ;;  %643 = vst.msk [vmem:[%s4784_s9 + $0xd0] sm:$0x1] %vm629_vm2, %v608_v53  ;;  %v563_v60 = vcombine.high %v559_v56, %v559_v56 }
 0x289   : > { %644 = vst.msk [vmem:[%s4784_s9 + $0xe0] sm:$0x1] %vm629_vm2, %v610_v54  ;;  %633 = vst.msk [vmem:[%s4784_s9 + $0x30] sm:$0x1] %vm629_vm2, %v562_v58 }
 0x28a   : > { %635 = vst.msk [vmem:[%s4784_s9 + $0x50] sm:$0x1] %vm629_vm2, %v559_v56  ;;  %636 = vst.msk [vmem:[%s4784_s9 + $0x60] sm:$0x1] %vm629_vm2, %v561_v57 }
 0x28b   : > { %645 = vst.msk [vmem:[%s4784_s9 + $0xf0] sm:$0x1] %vm629_vm2, %v612_v59  ;;  %637 = vst.msk [vmem:[%s4784_s9 + $0x70] sm:$0x1] %vm629_vm2, %v563_v60 }
 0x300   : > { %v4100_v61 = vpop.f32.mrb[2].mxu1 }
 0x301   : > { %v780_v62 = vcombine.high %v4100_v61, %v4100_v61  ;;  %v787_v63 = vrot.slane %v4100_v61, %v4773_v32  ;;  %v720_v0 = vpop.f32.mrb[3].mxu1 }
 0x302   : > { %v731_v1 = vcombine.high %v720_v0, %v720_v0  ;;  %v738_v2 = vrot.slane %v720_v0, %v4773_v32 }
 0x303   : > { %v794_v3 = vrot.slane %v780_v62, %v4773_v32  ;;  %v795_v4 = vcombine.high %v787_v63, %v787_v63  ;;  %v803_v5 = vrot.slane %v787_v63, %v4773_v32 }
 0x304   : > { %v745_v6 = vrot.slane %v731_v1, %v4773_v32  ;;  %v746_v7 = vcombine.high %v738_v2, %v738_v2  ;;  %v754_v8 = vrot.slane %v738_v2, %v4773_v32  ;;  %v4114_v9 = vpop.f32.mrb[4].mxu0 }
 0x305   : > { %v796_v10 = vcombine.high %v794_v3, %v794_v3  ;;  %v810_v11 = vrot.slane %v794_v3, %v4773_v32  ;;  %v817_v12 = vrot.slane %v795_v4, %v4773_v32  ;;  %v825_v13 = vcombine.high %v803_v5, %v803_v5  ;;  %853 = vst.msk [vmem:[%s4784_s9 + $0x81] sm:$0x1] %vm629_vm2, %v803_v5  ;;  %v1150_v14 = vpop.f32.mrb[5].mxu0 }
 0x306   : > { %v747_v15 = vcombine.high %v745_v6, %v745_v6  ;;  %v761_v16 = vrot.slane %v745_v6, %v4773_v32  ;;  %v768_v17 = vrot.slane %v746_v7, %v4773_v32  ;;  %v776_v18 = vcombine.high %v754_v8, %v754_v8  ;;  %845 = vst.msk [vmem:[%s4784_s9 + $0x1] sm:$0x1] %vm629_vm2, %v754_v8 }
 0x307   : > { %v824_v19 = vrot.slane %v796_v10, %v4773_v32  ;;  %v826_v20 = vcombine.high %v810_v11, %v810_v11  ;;  %v827_v21 = vcombine.high %v817_v12, %v817_v12  ;;  %854 = vst.msk [vmem:[%s4784_s9 + $0x91] sm:$0x1] %vm629_vm2, %v817_v12  ;;  %855 = vst.msk [vmem:[%s4784_s9 + $0xa1] sm:$0x1] %vm629_vm2, %v825_v13 }
 0x308   : > { %857 = vst.msk [vmem:[%s4784_s9 + $0xc1] sm:$0x1] %vm629_vm2, %v810_v11  ;;  %v1210_v22 = vcombine.high %v4114_v9, %v4114_v9  ;;  %v775_v23 = vrot.slane %v747_v15, %v4773_v32  ;;  %v777_v24 = vcombine.high %v761_v16, %v761_v16  ;;  %v778_v25 = vcombine.high %v768_v17, %v768_v17  ;;  %v4107_v27 = vpop.f32.mrb[4].mxu1  ;;  %v4851_v28 = vpop.f32.mrb[6].mxu0 }
 0x309   : > { %846 = vst.msk [vmem:[%s4784_s9 + $0x11] sm:$0x1] %vm629_vm2, %v768_v17  ;;  %847 = vst.msk [vmem:[%s4784_s9 + $0x21] sm:$0x1] %vm629_vm2, %v776_v18  ;;  %v1217_v26 = vrot.slane %v4114_v9, %v4773_v32  ;;  %v828_v29 = vcombine.high %v824_v19, %v824_v19  ;;  %v1161_v31 = vcombine.high %v1150_v14, %v1150_v14  ;;  %v4861_v34 = vpop.f32.mrb[5].mxu1  ;;  %v4863_v35 = vpop.f32.mrb[7].mxu0 }
 0x30a   : > { %849 = vst.msk [vmem:[%s4784_s9 + $0x41] sm:$0x1] %vm629_vm2, %v761_v16  ;;  %856 = vst.msk [vmem:[%s4784_s9 + $0xb1] sm:$0x1] %vm629_vm2, %v827_v21  ;;  %v1224_v30 = vrot.slane %v1210_v22, %v4773_v32  ;;  %v1168_v33 = vrot.slane %v1150_v14, %v4773_v32  ;;  %v779_v36 = vcombine.high %v775_v23, %v775_v23 }
 0x30b   : > { %858 = vst.msk [vmem:[%s4784_s9 + $0xd1] sm:$0x1] %vm629_vm2, %v824_v19  ;;  %859 = vst.msk [vmem:[%s4784_s9 + $0xe1] sm:$0x1] %vm629_vm2, %v826_v20  ;;  %v1225_v37 = vcombine.high %v1217_v26, %v1217_v26  ;;  %v1233_v38 = vrot.slane %v1217_v26, %v4773_v32  ;;  %v995_v39 = vcombine.high %v4107_v27, %v4107_v27 }
 0x30c   : > { %848 = vst.msk [vmem:[%s4784_s9 + $0x31] sm:$0x1] %vm629_vm2, %v778_v25  ;;  %850 = vst.msk [vmem:[%s4784_s9 + $0x51] sm:$0x1] %vm629_vm2, %v775_v23  ;;  %v1226_v40 = vcombine.high %v1224_v30, %v1224_v30  ;;  %v1240_v41 = vrot.slane %v1224_v30, %v4773_v32  ;;  %v1175_v42 = vrot.slane %v1161_v31, %v4773_v32  ;;  %v4883_v48 = vpop.f32.mrb[6].mxu1 }
 0x30d   : > { %851 = vst.msk [vmem:[%s4784_s9 + $0x61] sm:$0x1] %vm629_vm2, %v777_v24  ;;  %860 = vst.msk [vmem:[%s4784_s9 + $0xf1] sm:$0x1] %vm629_vm2, %v828_v29  ;;  %v1176_v43 = vcombine.high %v1168_v33, %v1168_v33  ;;  %v1247_v44 = vrot.slane %v1225_v37, %v4773_v32  ;;  %v1255_v45 = vcombine.high %v1233_v38, %v1233_v38  ;;  %v4889_v53 = vpop.f32.mrb[7].mxu1 }
 0x30e   : > { %852 = vst.msk [vmem:[%s4784_s9 + $0x71] sm:$0x1] %vm629_vm2, %v779_v36  ;;  %1283 = vst.msk [vmem:[%s4784_s9 + $0x83] sm:$0x1] %vm629_vm2, %v1233_v38  ;;  %v1184_v46 = vrot.slane %v1168_v33, %v4773_v32  ;;  %v1002_v47 = vrot.slane %v4107_v27, %v4773_v32  ;;  %v1254_v49 = vrot.slane %v1226_v40, %v4773_v32 }
 0x30f   : > { %v1256_v50 = vcombine.high %v1240_v41, %v1240_v41  ;;  %1287 = vst.msk [vmem:[%s4784_s9 + $0xc3] sm:$0x1] %vm629_vm2, %v1240_v41  ;;  %v1177_v51 = vcombine.high %v1175_v42, %v1175_v42  ;;  %v1191_v52 = vrot.slane %v1175_v42, %v4773_v32  ;;  %v1257_v54 = vcombine.high %v1247_v44, %v1247_v44 }
 0x310   : > { %1284 = vst.msk [vmem:[%s4784_s9 + $0x93] sm:$0x1] %vm629_vm2, %v1247_v44  ;;  %1285 = vst.msk [vmem:[%s4784_s9 + $0xa3] sm:$0x1] %vm629_vm2, %v1255_v45  ;;  %v1198_v55 = vrot.slane %v1176_v43, %v4773_v32  ;;  %v1206_v56 = vcombine.high %v1184_v46, %v1184_v46  ;;  %v1009_v57 = vrot.slane %v995_v39, %v4773_v32  ;;  %v4914_v2 = vpop.f32.mrb[8].mxu1  ;;  %v4916_v3 = vpop.f32.mrb[8].mxu0 }
 0x311   : > { %1275 = vst.msk [vmem:[%s4784_s9 + $0x3] sm:$0x1] %vm629_vm2, %v1184_v46  ;;  %v1258_v58 = vcombine.high %v1254_v49, %v1254_v49  ;;  %1288 = vst.msk [vmem:[%s4784_s9 + $0xd3] sm:$0x1] %vm629_vm2, %v1254_v49  ;;  %v1205_v59 = vrot.slane %v1177_v51, %v4773_v32  ;;  %v1207_v60 = vcombine.high %v1191_v52, %v1191_v52  ;;  %v4929_v8 = vpop.f32.mrb[9].mxu1  ;;  %v4931_v9 = vpop.f32.mrb[9].mxu0 }
 0x312   : > { %1289 = vst.msk [vmem:[%s4784_s9 + $0xe3] sm:$0x1] %vm629_vm2, %v1256_v50  ;;  %1279 = vst.msk [vmem:[%s4784_s9 + $0x43] sm:$0x1] %vm629_vm2, %v1191_v52  ;;  %v1010_v61 = vcombine.high %v1002_v47, %v1002_v47  ;;  %v1208_v62 = vcombine.high %v1198_v55, %v1198_v55  ;;  %v1011_v63 = vcombine.high %v1009_v57, %v1009_v57 }
 0x313   : > { %1286 = vst.msk [vmem:[%s4784_s9 + $0xb3] sm:$0x1] %vm629_vm2, %v1257_v54  ;;  %1276 = vst.msk [vmem:[%s4784_s9 + $0x13] sm:$0x1] %vm629_vm2, %v1198_v55  ;;  %v1018_v0 = vrot.slane %v1002_v47, %v4773_v32  ;;  %v1025_v1 = vrot.slane %v1009_v57, %v4773_v32  ;;  %v1209_v4 = vcombine.high %v1205_v59, %v1205_v59 }
 0x314   : > { %1277 = vst.msk [vmem:[%s4784_s9 + $0x23] sm:$0x1] %vm629_vm2, %v1206_v56  ;;  %1290 = vst.msk [vmem:[%s4784_s9 + $0xf3] sm:$0x1] %vm629_vm2, %v1258_v58  ;;  %v1032_v5 = vrot.slane %v1010_v61, %v4773_v32  ;;  %v1640_v6 = vcombine.high %v4851_v28, %v4851_v28  ;;  %v1647_v7 = vrot.slane %v4851_v28, %v4773_v32  ;;  %v4959_v22 = vpop.f32.mrb[10].mxu1  ;;  %v4961_v23 = vpop.f32.mrb[10].mxu0 }
 0x315   : > { %1280 = vst.msk [vmem:[%s4784_s9 + $0x53] sm:$0x1] %vm629_vm2, %v1205_v59  ;;  %1281 = vst.msk [vmem:[%s4784_s9 + $0x63] sm:$0x1] %vm629_vm2, %v1207_v60  ;;  %v1039_v10 = vrot.slane %v1011_v63, %v4773_v32  ;;  %v1040_v11 = vcombine.high %v1018_v0, %v1018_v0  ;;  %v1041_v12 = vcombine.high %v1025_v1, %v1025_v1  ;;  %v4969_v28 = vpop.f32.mrb[11].mxu1  ;;  %v4971_v29 = vpop.f32.mrb[11].mxu0 }
 0x316   : > { %1278 = vst.msk [vmem:[%s4784_s9 + $0x33] sm:$0x1] %vm629_vm2, %v1208_v62  ;;  %1068 = vst.msk [vmem:[%s4784_s9 + $0x82] sm:$0x1] %vm629_vm2, %v1018_v0  ;;  %v946_v13 = vcombine.high %v4861_v34, %v4861_v34  ;;  %v1042_v14 = vcombine.high %v1032_v5, %v1032_v5  ;;  %v1654_v15 = vrot.slane %v1640_v6, %v4773_v32 }
 0x317   : > { %1072 = vst.msk [vmem:[%s4784_s9 + $0xc2] sm:$0x1] %vm629_vm2, %v1025_v1  ;;  %1282 = vst.msk [vmem:[%s4784_s9 + $0x73] sm:$0x1] %vm629_vm2, %v1209_v4  ;;  %v1655_v16 = vcombine.high %v1647_v7, %v1647_v7  ;;  %v1663_v17 = vrot.slane %v1647_v7, %v4773_v32  ;;  %v1043_v18 = vcombine.high %v1039_v10, %v1039_v10 }
 0x318   : > { %1069 = vst.msk [vmem:[%s4784_s9 + $0x92] sm:$0x1] %vm629_vm2, %v1032_v5  ;;  %1070 = vst.msk [vmem:[%s4784_s9 + $0xa2] sm:$0x1] %vm629_vm2, %v1040_v11  ;;  %v953_v19 = vrot.slane %v4861_v34, %v4773_v32  ;;  %v960_v20 = vrot.slane %v946_v13, %v4773_v32  ;;  %v1591_v21 = vcombine.high %v4863_v35, %v4863_v35  ;;  %v4992_v44 = vpop.f32.mrb[12].mxu1  ;;  %v4994_v45 = vpop.f32.mrb[12].mxu0 }
 0x319   : > { %1073 = vst.msk [vmem:[%s4784_s9 + $0xd2] sm:$0x1] %vm629_vm2, %v1039_v10  ;;  %1074 = vst.msk [vmem:[%s4784_s9 + $0xe2] sm:$0x1] %vm629_vm2, %v1041_v12  ;;  %v1656_v24 = vcombine.high %v1654_v15, %v1654_v15  ;;  %v1670_v25 = vrot.slane %v1654_v15, %v4773_v32  ;;  %v1677_v26 = vrot.slane %v1655_v16, %v4773_v32  ;;  %v5004_v50 = vpop.f32.mrb[13].mxu1  ;;  %v5006_v51 = vpop.f32.mrb[13].mxu0 }
 0x31a   : > { %1071 = vst.msk [vmem:[%s4784_s9 + $0xb2] sm:$0x1] %vm629_vm2, %v1042_v14  ;;  %v1685_v27 = vcombine.high %v1663_v17, %v1663_v17  ;;  %1713 = vst.msk [vmem:[%s4784_s9 + $0x85] sm:$0x1] %vm629_vm2, %v1663_v17  ;;  %v961_v30 = vcombine.high %v953_v19, %v953_v19  ;;  %v962_v31 = vcombine.high %v960_v20, %v960_v20 }
 0x31b   : > { %1075 = vst.msk [vmem:[%s4784_s9 + $0xf2] sm:$0x1] %vm629_vm2, %v1043_v18  ;;  %v969_v33 = vrot.slane %v953_v19, %v4773_v32  ;;  %v976_v34 = vrot.slane %v960_v20, %v4773_v32  ;;  %v1684_v36 = vrot.slane %v1656_v24, %v4773_v32  ;;  %v1686_v37 = vcombine.high %v1670_v25, %v1670_v25 }
 0x31c   : > { %v1687_v38 = vcombine.high %v1677_v26, %v1677_v26  ;;  %1714 = vst.msk [vmem:[%s4784_s9 + $0x95] sm:$0x1] %vm629_vm2, %v1677_v26  ;;  %1715 = vst.msk [vmem:[%s4784_s9 + $0xa5] sm:$0x1] %vm629_vm2, %v1685_v27  ;;  %v1598_v39 = vrot.slane %v4863_v35, %v4773_v32  ;;  %v983_v40 = vrot.slane %v961_v30, %v4773_v32  ;;  %v5034_v0 = vpop.f32.mrb[14].mxu1  ;;  %v5036_v1 = vpop.f32.mrb[14].mxu0 }
 0x31d   : > { %1717 = vst.msk [vmem:[%s4784_s9 + $0xc5] sm:$0x1] %vm629_vm2, %v1670_v25  ;;  %v990_v41 = vrot.slane %v962_v31, %v4773_v32  ;;  %v991_v42 = vcombine.high %v969_v33, %v969_v33  ;;  %v992_v43 = vcombine.high %v976_v34, %v976_v34  ;;  %1060 = vst.msk [vmem:[%s4784_s9 + $0x2] sm:$0x1] %vm629_vm2, %v969_v33  ;;  %v5047_v10 = vpop.f32.mrb[15].mxu1  ;;  %v5049_v11 = vpop.f32.mrb[15].mxu0 }
 0x31e   : > { %1064 = vst.msk [vmem:[%s4784_s9 + $0x42] sm:$0x1] %vm629_vm2, %v976_v34  ;;  %v1688_v46 = vcombine.high %v1684_v36, %v1684_v36  ;;  %1716 = vst.msk [vmem:[%s4784_s9 + $0xb5] sm:$0x1] %vm629_vm2, %v1687_v38  ;;  %v1605_v35 = vrot.slane %v1591_v21, %v4773_v32  ;;  %v1606_v47 = vcombine.high %v1598_v39, %v1598_v39 }
 0x31f   : > { %1718 = vst.msk [vmem:[%s4784_s9 + $0xd5] sm:$0x1] %vm629_vm2, %v1684_v36  ;;  %1719 = vst.msk [vmem:[%s4784_s9 + $0xe5] sm:$0x1] %vm629_vm2, %v1686_v37  ;;  %v1614_v49 = vrot.slane %v1598_v39, %v4773_v32  ;;  %v993_v52 = vcombine.high %v983_v40, %v983_v40  ;;  %v994_v54 = vcombine.high %v990_v41, %v990_v41 }
 0x320   : > { %1061 = vst.msk [vmem:[%s4784_s9 + $0x12] sm:$0x1] %vm629_vm2, %v983_v40  ;;  %1062 = vst.msk [vmem:[%s4784_s9 + $0x22] sm:$0x1] %vm629_vm2, %v991_v42  ;;  %v1425_v55 = vcombine.high %v4883_v48, %v4883_v48  ;;  %v1432_v56 = vrot.slane %v4883_v48, %v4773_v32  ;;  %v1607_v57 = vcombine.high %v1605_v35, %v1605_v35  ;;  %v5072_v25 = vpop.f32.mrb[16].mxu1  ;;  %v5074_v26 = vpop.f32.mrb[16].mxu0 }
 0x321   : > { %1065 = vst.msk [vmem:[%s4784_s9 + $0x52] sm:$0x1] %vm629_vm2, %v990_v41  ;;  %1066 = vst.msk [vmem:[%s4784_s9 + $0x62] sm:$0x1] %vm629_vm2, %v992_v43  ;;  %v1621_v58 = vrot.slane %v1605_v35, %v4773_v32  ;;  %v1628_v59 = vrot.slane %v1606_v47, %v4773_v32  ;;  %v1636_v60 = vcombine.high %v1614_v49, %v1614_v49  ;;  %v5082_v34 = vpop.f32.mrb[17].mxu1  ;;  %v5084_v36 = vpop.f32.mrb[17].mxu0 }
 0x322   : > { %1720 = vst.msk [vmem:[%s4784_s9 + $0xf5] sm:$0x1] %vm629_vm2, %v1688_v46  ;;  %1705 = vst.msk [vmem:[%s4784_s9 + $0x5] sm:$0x1] %vm629_vm2, %v1614_v49  ;;  %v1439_v61 = vrot.slane %v1425_v55, %v4773_v32  ;;  %v1440_v48 = vcombine.high %v1432_v56, %v1432_v56  ;;  %v1448_v62 = vrot.slane %v1432_v56, %v4773_v32 }
 0x323   : > { %1063 = vst.msk [vmem:[%s4784_s9 + $0x32] sm:$0x1] %vm629_vm2, %v993_v52  ;;  %1067 = vst.msk [vmem:[%s4784_s9 + $0x72] sm:$0x1] %vm629_vm2, %v994_v54  ;;  %v1376_v63 = vcombine.high %v4889_v53, %v4889_v53  ;;  %v1635_v4 = vrot.slane %v1607_v57, %v4773_v32  ;;  %v1637_v5 = vcombine.high %v1621_v58, %v1621_v58 }
 0x324   : > { %v1638_v6 = vcombine.high %v1628_v59, %v1628_v59  ;;  %1706 = vst.msk [vmem:[%s4784_s9 + $0x15] sm:$0x1] %vm629_vm2, %v1628_v59  ;;  %1707 = vst.msk [vmem:[%s4784_s9 + $0x25] sm:$0x1] %vm629_vm2, %v1636_v60  ;;  %v1383_v7 = vrot.slane %v4889_v53, %v4773_v32  ;;  %v1441_v12 = vcombine.high %v1439_v61, %v1439_v61 }
 0x325   : > { %1709 = vst.msk [vmem:[%s4784_s9 + $0x45] sm:$0x1] %vm629_vm2, %v1621_v58  ;;  %v1455_v13 = vrot.slane %v1439_v61, %v4773_v32  ;;  %v1462_v14 = vrot.slane %v1440_v48, %v4773_v32  ;;  %v1470_v15 = vcombine.high %v1448_v62, %v1448_v62  ;;  %1498 = vst.msk [vmem:[%s4784_s9 + $0x84] sm:$0x1] %vm629_vm2, %v1448_v62 }
 0x326   : > { %v1639_v16 = vcombine.high %v1635_v4, %v1635_v4  ;;  %1708 = vst.msk [vmem:[%s4784_s9 + $0x35] sm:$0x1] %vm629_vm2, %v1638_v6  ;;  %1710 = vst.msk [vmem:[%s4784_s9 + $0x55] sm:$0x1] %vm629_vm2, %v1635_v4  ;;  %v1390_v53 = vrot.slane %v1376_v63, %v4773_v32  ;;  %v1391_v17 = vcombine.high %v1383_v7, %v1383_v7 }
 0x327   : > { %1711 = vst.msk [vmem:[%s4784_s9 + $0x65] sm:$0x1] %vm629_vm2, %v1637_v5  ;;  %v1399_v18 = vrot.slane %v1383_v7, %v4773_v32  ;;  %v1469_v19 = vrot.slane %v1441_v12, %v4773_v32  ;;  %v1471_v20 = vcombine.high %v1455_v13, %v1455_v13  ;;  %v1472_v21 = vcombine.high %v1462_v14, %v1462_v14 }
 0x328   : > { %1499 = vst.msk [vmem:[%s4784_s9 + $0x94] sm:$0x1] %vm629_vm2, %v1462_v14  ;;  %1500 = vst.msk [vmem:[%s4784_s9 + $0xa4] sm:$0x1] %vm629_vm2, %v1470_v15  ;;  %v1855_v24 = vcombine.high %v4914_v2, %v4914_v2  ;;  %v1392_v27 = vcombine.high %v1390_v53, %v1390_v53  ;;  %v1406_v30 = vrot.slane %v1390_v53, %v4773_v32 }
 0x329   : > { %1502 = vst.msk [vmem:[%s4784_s9 + $0xc4] sm:$0x1] %vm629_vm2, %v1455_v13  ;;  %1712 = vst.msk [vmem:[%s4784_s9 + $0x75] sm:$0x1] %vm629_vm2, %v1639_v16  ;;  %v1413_v31 = vrot.slane %v1391_v17, %v4773_v32  ;;  %v1421_v33 = vcombine.high %v1399_v18, %v1399_v18  ;;  %v1473_v37 = vcombine.high %v1469_v19, %v1469_v19 }
 0x32a   : > { %1490 = vst.msk [vmem:[%s4784_s9 + $0x4] sm:$0x1] %vm629_vm2, %v1399_v18  ;;  %1501 = vst.msk [vmem:[%s4784_s9 + $0xb4] sm:$0x1] %vm629_vm2, %v1472_v21  ;;  %v1862_v38 = vrot.slane %v4914_v2, %v4773_v32  ;;  %v1869_v39 = vrot.slane %v1855_v24, %v4773_v32  ;;  %v2070_v40 = vcombine.high %v4916_v3, %v4916_v3 }
 0x32b   : > { %1503 = vst.msk [vmem:[%s4784_s9 + $0xd4] sm:$0x1] %vm629_vm2, %v1469_v19  ;;  %1504 = vst.msk [vmem:[%s4784_s9 + $0xe4] sm:$0x1] %vm629_vm2, %v1471_v20  ;;  %v1420_v41 = vrot.slane %v1392_v27, %v4773_v32  ;;  %v1422_v42 = vcombine.high %v1406_v30, %v1406_v30  ;;  %v1423_v43 = vcombine.high %v1413_v31, %v1413_v31 }
 0x32c   : > { %1491 = vst.msk [vmem:[%s4784_s9 + $0x14] sm:$0x1] %vm629_vm2, %v1413_v31  ;;  %1492 = vst.msk [vmem:[%s4784_s9 + $0x24] sm:$0x1] %vm629_vm2, %v1421_v33  ;;  %v2077_v2 = vrot.slane %v4916_v3, %v4773_v32  ;;  %v1870_v46 = vcombine.high %v1862_v38, %v1862_v38  ;;  %v1871_v35 = vcombine.high %v1869_v39, %v1869_v39 }
 0x32d   : > { %1494 = vst.msk [vmem:[%s4784_s9 + $0x44] sm:$0x1] %vm629_vm2, %v1406_v30  ;;  %1505 = vst.msk [vmem:[%s4784_s9 + $0xf4] sm:$0x1] %vm629_vm2, %v1473_v37  ;;  %v1878_v47 = vrot.slane %v1862_v38, %v4773_v32  ;;  %v1885_v49 = vrot.slane %v1869_v39, %v4773_v32  ;;  %v1424_v52 = vcombine.high %v1420_v41, %v1420_v41 }
 0x32e   : > { %1493 = vst.msk [vmem:[%s4784_s9 + $0x34] sm:$0x1] %vm629_vm2, %v1423_v43  ;;  %1495 = vst.msk [vmem:[%s4784_s9 + $0x54] sm:$0x1] %vm629_vm2, %v1420_v41  ;;  %v2084_v3 = vrot.slane %v2070_v40, %v4773_v32  ;;  %v2085_v54 = vcombine.high %v2077_v2, %v2077_v2  ;;  %v2093_v55 = vrot.slane %v2077_v2, %v4773_v32 }
 0x32f   : > { %1496 = vst.msk [vmem:[%s4784_s9 + $0x64] sm:$0x1] %vm629_vm2, %v1422_v42  ;;  %v1892_v56 = vrot.slane %v1870_v46, %v4773_v32  ;;  %v1899_v57 = vrot.slane %v1871_v35, %v4773_v32  ;;  %v1900_v58 = vcombine.high %v1878_v47, %v1878_v47  ;;  %v1901_v59 = vcombine.high %v1885_v49, %v1885_v49 }
 0x330   : > { %1928 = vst.msk [vmem:[%s4784_s9 + $0x86] sm:$0x1] %vm629_vm2, %v1878_v47  ;;  %1932 = vst.msk [vmem:[%s4784_s9 + $0xc6] sm:$0x1] %vm629_vm2, %v1885_v49  ;;  %v2086_v60 = vcombine.high %v2084_v3, %v2084_v3  ;;  %v2100_v61 = vrot.slane %v2084_v3, %v4773_v32  ;;  %v2107_v48 = vrot.slane %v2085_v54, %v4773_v32 }
 0x331   : > { %1497 = vst.msk [vmem:[%s4784_s9 + $0x74] sm:$0x1] %vm629_vm2, %v1424_v52  ;;  %v2115_v62 = vcombine.high %v2093_v55, %v2093_v55  ;;  %2143 = vst.msk [vmem:[%s4784_s9 + $0x87] sm:$0x1] %vm629_vm2, %v2093_v55  ;;  %v1902_v63 = vcombine.high %v1892_v56, %v1892_v56  ;;  %v1903_v4 = vcombine.high %v1899_v57, %v1899_v57 }
 0x332   : > { %1929 = vst.msk [vmem:[%s4784_s9 + $0x96] sm:$0x1] %vm629_vm2, %v1892_v56  ;;  %1930 = vst.msk [vmem:[%s4784_s9 + $0xa6] sm:$0x1] %vm629_vm2, %v1900_v58  ;;  %v1806_v5 = vcombine.high %v4929_v8, %v4929_v8  ;;  %v1813_v6 = vrot.slane %v4929_v8, %v4773_v32  ;;  %v2114_v7 = vrot.slane %v2086_v60, %v4773_v32 }
 0x333   : > { %1933 = vst.msk [vmem:[%s4784_s9 + $0xd6] sm:$0x1] %vm629_vm2, %v1899_v57  ;;  %1934 = vst.msk [vmem:[%s4784_s9 + $0xe6] sm:$0x1] %vm629_vm2, %v1901_v59  ;;  %v2116_v12 = vcombine.high %v2100_v61, %v2100_v61  ;;  %v2117_v13 = vcombine.high %v2107_v48, %v2107_v48  ;;  %v2021_v14 = vcombine.high %v4931_v9, %v4931_v9 }
 0x334   : > { %2144 = vst.msk [vmem:[%s4784_s9 + $0x97] sm:$0x1] %vm629_vm2, %v2107_v48  ;;  %2145 = vst.msk [vmem:[%s4784_s9 + $0xa7] sm:$0x1] %vm629_vm2, %v2115_v62  ;;  %v1820_v8 = vrot.slane %v1806_v5, %v4773_v32  ;;  %v1821_v15 = vcombine.high %v1813_v6, %v1813_v6  ;;  %v1829_v16 = vrot.slane %v1813_v6, %v4773_v32 }
 0x335   : > { %2147 = vst.msk [vmem:[%s4784_s9 + $0xc7] sm:$0x1] %vm629_vm2, %v2100_v61  ;;  %1931 = vst.msk [vmem:[%s4784_s9 + $0xb6] sm:$0x1] %vm629_vm2, %v1902_v63  ;;  %v2028_v53 = vrot.slane %v4931_v9, %v4773_v32  ;;  %v2118_v17 = vcombine.high %v2114_v7, %v2114_v7  ;;  %v2035_v18 = vrot.slane %v2021_v14, %v4773_v32 }
 0x336   : > { %1935 = vst.msk [vmem:[%s4784_s9 + $0xf6] sm:$0x1] %vm629_vm2, %v1903_v4  ;;  %2146 = vst.msk [vmem:[%s4784_s9 + $0xb7] sm:$0x1] %vm629_vm2, %v2117_v13  ;;  %v2283_v19 = vcombine.high %v4959_v22, %v4959_v22  ;;  %v2290_v20 = vrot.slane %v4959_v22, %v4773_v32  ;;  %v1822_v21 = vcombine.high %v1820_v8, %v1820_v8 }
 0x337   : > { %2148 = vst.msk [vmem:[%s4784_s9 + $0xd7] sm:$0x1] %vm629_vm2, %v2114_v7  ;;  %2149 = vst.msk [vmem:[%s4784_s9 + $0xe7] sm:$0x1] %vm629_vm2, %v2116_v12  ;;  %v1836_v9 = vrot.slane %v1820_v8, %v4773_v32  ;;  %v1843_v24 = vrot.slane %v1821_v15, %v4773_v32  ;;  %v1851_v27 = vcombine.high %v1829_v16, %v1829_v16 }
 0x338   : > { %1920 = vst.msk [vmem:[%s4784_s9 + $0x6] sm:$0x1] %vm629_vm2, %v1829_v16  ;;  %2150 = vst.msk [vmem:[%s4784_s9 + $0xf7] sm:$0x1] %vm629_vm2, %v2118_v17  ;;  %v2036_v30 = vcombine.high %v2028_v53, %v2028_v53  ;;  %v2037_v31 = vcombine.high %v2035_v18, %v2035_v18  ;;  %v2044_v33 = vrot.slane %v2028_v53, %v4773_v32 }
 0x339   : > { %v2051_v22 = vrot.slane %v2035_v18, %v4773_v32  ;;  %v1850_v37 = vrot.slane %v1822_v21, %v4773_v32  ;;  %v1852_v38 = vcombine.high %v1836_v9, %v1836_v9  ;;  %v1853_v39 = vcombine.high %v1843_v24, %v1843_v24  ;;  %1921 = vst.msk [vmem:[%s4784_s9 + $0x16] sm:$0x1] %vm629_vm2, %v1843_v24 }
 0x33a   : > { %1922 = vst.msk [vmem:[%s4784_s9 + $0x26] sm:$0x1] %vm629_vm2, %v1851_v27  ;;  %1924 = vst.msk [vmem:[%s4784_s9 + $0x46] sm:$0x1] %vm629_vm2, %v1836_v9  ;;  %v2297_v40 = vrot.slane %v2283_v19, %v4773_v32  ;;  %v2058_v41 = vrot.slane %v2036_v30, %v4773_v32  ;;  %v2065_v42 = vrot.slane %v2037_v31, %v4773_v32 }
 0x33b   : > { %v2066_v43 = vcombine.high %v2044_v33, %v2044_v33  ;;  %v2067_v2 = vcombine.high %v2051_v22, %v2051_v22  ;;  %2135 = vst.msk [vmem:[%s4784_s9 + $0x7] sm:$0x1] %vm629_vm2, %v2044_v33  ;;  %2139 = vst.msk [vmem:[%s4784_s9 + $0x47] sm:$0x1] %vm629_vm2, %v2051_v22  ;;  %v1854_v46 = vcombine.high %v1850_v37, %v1850_v37 }
 0x33c   : > { %1923 = vst.msk [vmem:[%s4784_s9 + $0x36] sm:$0x1] %vm629_vm2, %v1853_v39  ;;  %1925 = vst.msk [vmem:[%s4784_s9 + $0x56] sm:$0x1] %vm629_vm2, %v1850_v37  ;;  %v2298_v35 = vcombine.high %v2290_v20, %v2290_v20  ;;  %v2299_v47 = vcombine.high %v2297_v40, %v2297_v40  ;;  %v2306_v49 = vrot.slane %v2290_v20, %v4773_v32 }
 0x33d   : > { %1926 = vst.msk [vmem:[%s4784_s9 + $0x66] sm:$0x1] %vm629_vm2, %v1852_v38  ;;  %v2068_v52 = vcombine.high %v2058_v41, %v2058_v41  ;;  %v2069_v3 = vcombine.high %v2065_v42, %v2065_v42  ;;  %2136 = vst.msk [vmem:[%s4784_s9 + $0x17] sm:$0x1] %vm629_vm2, %v2058_v41  ;;  %v2313_v54 = vrot.slane %v2297_v40, %v4773_v32 }
 0x33e   : > { %2137 = vst.msk [vmem:[%s4784_s9 + $0x27] sm:$0x1] %vm629_vm2, %v2066_v43  ;;  %2140 = vst.msk [vmem:[%s4784_s9 + $0x57] sm:$0x1] %vm629_vm2, %v2065_v42  ;;  %v2498_v55 = vcombine.high %v4961_v23, %v4961_v23  ;;  %v2320_v56 = vrot.slane %v2298_v35, %v4773_v32  ;;  %v2327_v57 = vrot.slane %v2299_v47, %v4773_v32 }
 0x33f   : > { %2141 = vst.msk [vmem:[%s4784_s9 + $0x67] sm:$0x1] %vm629_vm2, %v2067_v2  ;;  %1927 = vst.msk [vmem:[%s4784_s9 + $0x76] sm:$0x1] %vm629_vm2, %v1854_v46  ;;  %v2328_v58 = vcombine.high %v2306_v49, %v2306_v49  ;;  %v2505_v59 = vrot.slane %v4961_v23, %v4773_v32  ;;  %v2329_v60 = vcombine.high %v2313_v54, %v2313_v54 }
 0x340   : > { %2356 = vst.msk [vmem:[%s4784_s9 + $0x88] sm:$0x1] %vm629_vm2, %v2306_v49  ;;  %2138 = vst.msk [vmem:[%s4784_s9 + $0x37] sm:$0x1] %vm629_vm2, %v2068_v52  ;;  %v2512_v61 = vrot.slane %v2498_v55, %v4773_v32  ;;  %v2234_v48 = vcombine.high %v4969_v28, %v4969_v28  ;;  %v2241_v62 = vrot.slane %v4969_v28, %v4773_v32 }
 0x341   : > { %2142 = vst.msk [vmem:[%s4784_s9 + $0x77] sm:$0x1] %vm629_vm2, %v2069_v3  ;;  %2360 = vst.msk [vmem:[%s4784_s9 + $0xc8] sm:$0x1] %vm629_vm2, %v2313_v54  ;;  %v2330_v63 = vcombine.high %v2320_v56, %v2320_v56  ;;  %v2331_v23 = vcombine.high %v2327_v57, %v2327_v57  ;;  %v2513_v4 = vcombine.high %v2505_v59, %v2505_v59 }
 0x342   : > { %2357 = vst.msk [vmem:[%s4784_s9 + $0x98] sm:$0x1] %vm629_vm2, %v2320_v56  ;;  %2358 = vst.msk [vmem:[%s4784_s9 + $0xa8] sm:$0x1] %vm629_vm2, %v2328_v58  ;;  %v2521_v5 = vrot.slane %v2505_v59, %v4773_v32  ;;  %v2514_v6 = vcombine.high %v2512_v61, %v2512_v61  ;;  %v2528_v7 = vrot.slane %v2512_v61, %v4773_v32 }
 0x343   : > { %2361 = vst.msk [vmem:[%s4784_s9 + $0xd8] sm:$0x1] %vm629_vm2, %v2327_v57  ;;  %2362 = vst.msk [vmem:[%s4784_s9 + $0xe8] sm:$0x1] %vm629_vm2, %v2329_v60  ;;  %v2248_v28 = vrot.slane %v2234_v48, %v4773_v32  ;;  %v2249_v12 = vcombine.high %v2241_v62, %v2241_v62  ;;  %v2535_v13 = vrot.slane %v2513_v4, %v4773_v32 }
 0x344   : > { %2359 = vst.msk [vmem:[%s4784_s9 + $0xb8] sm:$0x1] %vm629_vm2, %v2330_v63  ;;  %2363 = vst.msk [vmem:[%s4784_s9 + $0xf8] sm:$0x1] %vm629_vm2, %v2331_v23  ;;  %v2543_v14 = vcombine.high %v2521_v5, %v2521_v5  ;;  %v2257_v8 = vrot.slane %v2241_v62, %v4773_v32  ;;  %v2449_v15 = vcombine.high %v4971_v29, %v4971_v29 }
 0x345   : > { %2571 = vst.msk [vmem:[%s4784_s9 + $0x89] sm:$0x1] %vm629_vm2, %v2521_v5  ;;  %v2542_v16 = vrot.slane %v2514_v6, %v4773_v32  ;;  %v2544_v53 = vcombine.high %v2528_v7, %v2528_v7  ;;  %2575 = vst.msk [vmem:[%s4784_s9 + $0xc9] sm:$0x1] %vm629_vm2, %v2528_v7  ;;  %v2250_v17 = vcombine.high %v2248_v28, %v2248_v28 }
 0x346   : > { %v2264_v18 = vrot.slane %v2248_v28, %v4773_v32  ;;  %v2545_v19 = vcombine.high %v2535_v13, %v2535_v13  ;;  %2572 = vst.msk [vmem:[%s4784_s9 + $0x99] sm:$0x1] %vm629_vm2, %v2535_v13  ;;  %2573 = vst.msk [vmem:[%s4784_s9 + $0xa9] sm:$0x1] %vm629_vm2, %v2543_v14  ;;  %v2271_v20 = vrot.slane %v2249_v12, %v4773_v32 }
 0x347   : > { %v2279_v21 = vcombine.high %v2257_v8, %v2257_v8  ;;  %2348 = vst.msk [vmem:[%s4784_s9 + $0x8] sm:$0x1] %vm629_vm2, %v2257_v8  ;;  %v2456_v9 = vrot.slane %v4971_v29, %v4773_v32  ;;  %v2546_v24 = vcombine.high %v2542_v16, %v2542_v16  ;;  %2576 = vst.msk [vmem:[%s4784_s9 + $0xd9] sm:$0x1] %vm629_vm2, %v2542_v16 }
 0x348   : > { %2577 = vst.msk [vmem:[%s4784_s9 + $0xe9] sm:$0x1] %vm629_vm2, %v2544_v53  ;;  %v2278_v27 = vrot.slane %v2250_v17, %v4773_v32  ;;  %v2280_v30 = vcombine.high %v2264_v18, %v2264_v18  ;;  %2352 = vst.msk [vmem:[%s4784_s9 + $0x48] sm:$0x1] %vm629_vm2, %v2264_v18  ;;  %v2463_v31 = vrot.slane %v2449_v15, %v4773_v32 }
 0x349   : > { %2574 = vst.msk [vmem:[%s4784_s9 + $0xb9] sm:$0x1] %vm629_vm2, %v2545_v19  ;;  %v2281_v33 = vcombine.high %v2271_v20, %v2271_v20  ;;  %2349 = vst.msk [vmem:[%s4784_s9 + $0x18] sm:$0x1] %vm629_vm2, %v2271_v20  ;;  %v2464_v29 = vcombine.high %v2456_v9, %v2456_v9  ;;  %v2472_v22 = vrot.slane %v2456_v9, %v4773_v32 }
 0x34a   : > { %2350 = vst.msk [vmem:[%s4784_s9 + $0x28] sm:$0x1] %vm629_vm2, %v2279_v21  ;;  %v2713_v37 = vcombine.high %v4992_v44, %v4992_v44  ;;  %2578 = vst.msk [vmem:[%s4784_s9 + $0xf9] sm:$0x1] %vm629_vm2, %v2546_v24  ;;  %v2282_v38 = vcombine.high %v2278_v27, %v2278_v27  ;;  %v2465_v39 = vcombine.high %v2463_v31, %v2463_v31 }
 0x34b   : > { %2353 = vst.msk [vmem:[%s4784_s9 + $0x58] sm:$0x1] %vm629_vm2, %v2278_v27  ;;  %2354 = vst.msk [vmem:[%s4784_s9 + $0x68] sm:$0x1] %vm629_vm2, %v2280_v30  ;;  %v2479_v40 = vrot.slane %v2463_v31, %v4773_v32  ;;  %v2720_v41 = vrot.slane %v4992_v44, %v4773_v32  ;;  %v2486_v42 = vrot.slane %v2464_v29, %v4773_v32 }
 0x34c   : > { %2351 = vst.msk [vmem:[%s4784_s9 + $0x38] sm:$0x1] %vm629_vm2, %v2281_v33  ;;  %v2494_v43 = vcombine.high %v2472_v22, %v2472_v22  ;;  %2563 = vst.msk [vmem:[%s4784_s9 + $0x9] sm:$0x1] %vm629_vm2, %v2472_v22  ;;  %v2727_v2 = vrot.slane %v2713_v37, %v4773_v32  ;;  %v2928_v46 = vcombine.high %v4994_v45, %v4994_v45 }
 0x34d   : > { %2355 = vst.msk [vmem:[%s4784_s9 + $0x78] sm:$0x1] %vm629_vm2, %v2282_v38  ;;  %v2493_v35 = vrot.slane %v2465_v39, %v4773_v32  ;;  %v2495_v44 = vcombine.high %v2479_v40, %v2479_v40  ;;  %2567 = vst.msk [vmem:[%s4784_s9 + $0x49] sm:$0x1] %vm629_vm2, %v2479_v40  ;;  %v2728_v47 = vcombine.high %v2720_v41, %v2720_v41 }
 0x34e   : > { %v2736_v49 = vrot.slane %v2720_v41, %v4773_v32  ;;  %v2496_v52 = vcombine.high %v2486_v42, %v2486_v42  ;;  %2564 = vst.msk [vmem:[%s4784_s9 + $0x19] sm:$0x1] %vm629_vm2, %v2486_v42  ;;  %2565 = vst.msk [vmem:[%s4784_s9 + $0x29] sm:$0x1] %vm629_vm2, %v2494_v43  ;;  %v2729_v3 = vcombine.high %v2727_v2, %v2727_v2 }
 0x34f   : > { %v2743_v54 = vrot.slane %v2727_v2, %v4773_v32  ;;  %v2935_v55 = vrot.slane %v4994_v45, %v4773_v32  ;;  %v2497_v56 = vcombine.high %v2493_v35, %v2493_v35  ;;  %2568 = vst.msk [vmem:[%s4784_s9 + $0x59] sm:$0x1] %vm629_vm2, %v2493_v35  ;;  %2569 = vst.msk [vmem:[%s4784_s9 + $0x69] sm:$0x1] %vm629_vm2, %v2495_v44 }
 0x350   : > { %v2750_v57 = vrot.slane %v2728_v47, %v4773_v32  ;;  %v2758_v58 = vcombine.high %v2736_v49, %v2736_v49  ;;  %2786 = vst.msk [vmem:[%s4784_s9 + $0x8a] sm:$0x1] %vm629_vm2, %v2736_v49  ;;  %v2942_v59 = vrot.slane %v2928_v46, %v4773_v32  ;;  %2566 = vst.msk [vmem:[%s4784_s9 + $0x39] sm:$0x1] %vm629_vm2, %v2496_v52 }
 0x351   : > { %v2757_v45 = vrot.slane %v2729_v3, %v4773_v32  ;;  %v2759_v60 = vcombine.high %v2743_v54, %v2743_v54  ;;  %2790 = vst.msk [vmem:[%s4784_s9 + $0xca] sm:$0x1] %vm629_vm2, %v2743_v54  ;;  %v2943_v61 = vcombine.high %v2935_v55, %v2935_v55  ;;  %v2951_v48 = vrot.slane %v2935_v55, %v4773_v32 }
 0x352   : > { %2570 = vst.msk [vmem:[%s4784_s9 + $0x79] sm:$0x1] %vm629_vm2, %v2497_v56  ;;  %v2760_v62 = vcombine.high %v2750_v57, %v2750_v57  ;;  %2787 = vst.msk [vmem:[%s4784_s9 + $0x9a] sm:$0x1] %vm629_vm2, %v2750_v57  ;;  %v2944_v63 = vcombine.high %v2942_v59, %v2942_v59  ;;  %v2958_v23 = vrot.slane %v2942_v59, %v4773_v32 }
 0x353   : > { %2788 = vst.msk [vmem:[%s4784_s9 + $0xaa] sm:$0x1] %vm629_vm2, %v2758_v58  ;;  %v2664_v4 = vcombine.high %v5004_v50, %v5004_v50  ;;  %v2761_v5 = vcombine.high %v2757_v45, %v2757_v45  ;;  %2791 = vst.msk [vmem:[%s4784_s9 + $0xda] sm:$0x1] %vm629_vm2, %v2757_v45  ;;  %v2965_v6 = vrot.slane %v2943_v61, %v4773_v32 }
 0x354   : > { %2792 = vst.msk [vmem:[%s4784_s9 + $0xea] sm:$0x1] %vm629_vm2, %v2759_v60  ;;  %v2973_v7 = vcombine.high %v2951_v48, %v2951_v48  ;;  %3001 = vst.msk [vmem:[%s4784_s9 + $0x8b] sm:$0x1] %vm629_vm2, %v2951_v48  ;;  %v2671_v28 = vrot.slane %v5004_v50, %v4773_v32  ;;  %v2972_v12 = vrot.slane %v2944_v63, %v4773_v32 }
 0x355   : > { %2789 = vst.msk [vmem:[%s4784_s9 + $0xba] sm:$0x1] %vm629_vm2, %v2760_v62  ;;  %v2974_v13 = vcombine.high %v2958_v23, %v2958_v23  ;;  %3005 = vst.msk [vmem:[%s4784_s9 + $0xcb] sm:$0x1] %vm629_vm2, %v2958_v23  ;;  %v2678_v14 = vrot.slane %v2664_v4, %v4773_v32  ;;  %v2879_v8 = vcombine.high %v5006_v51, %v5006_v51 }
 0x356   : > { %2793 = vst.msk [vmem:[%s4784_s9 + $0xfa] sm:$0x1] %vm629_vm2, %v2761_v5  ;;  %v2975_v15 = vcombine.high %v2965_v6, %v2965_v6  ;;  %3002 = vst.msk [vmem:[%s4784_s9 + $0x9b] sm:$0x1] %vm629_vm2, %v2965_v6  ;;  %v2679_v50 = vcombine.high %v2671_v28, %v2671_v28  ;;  %v2687_v16 = vrot.slane %v2671_v28, %v4773_v32 }
 0x357   : > { %3003 = vst.msk [vmem:[%s4784_s9 + $0xab] sm:$0x1] %vm629_vm2, %v2973_v7  ;;  %v2886_v53 = vrot.slane %v5006_v51, %v4773_v32  ;;  %v2976_v17 = vcombine.high %v2972_v12, %v2972_v12  ;;  %3006 = vst.msk [vmem:[%s4784_s9 + $0xdb] sm:$0x1] %vm629_vm2, %v2972_v12  ;;  %v2680_v18 = vcombine.high %v2678_v14, %v2678_v14 }
 0x358   : > { %3007 = vst.msk [vmem:[%s4784_s9 + $0xeb] sm:$0x1] %vm629_vm2, %v2974_v13  ;;  %v2694_v19 = vrot.slane %v2678_v14, %v4773_v32  ;;  %v2893_v20 = vrot.slane %v2879_v8, %v4773_v32  ;;  %3004 = vst.msk [vmem:[%s4784_s9 + $0xbb] sm:$0x1] %vm629_vm2, %v2975_v15  ;;  %v2701_v21 = vrot.slane %v2679_v50, %v4773_v32 }
 0x359   : > { %v2709_v9 = vcombine.high %v2687_v16, %v2687_v16  ;;  %2778 = vst.msk [vmem:[%s4784_s9 + $0xa] sm:$0x1] %vm629_vm2, %v2687_v16  ;;  %v2894_v51 = vcombine.high %v2886_v53, %v2886_v53  ;;  %v2902_v24 = vrot.slane %v2886_v53, %v4773_v32  ;;  %3008 = vst.msk [vmem:[%s4784_s9 + $0xfb] sm:$0x1] %vm629_vm2, %v2976_v17 }
 0x35a   : > { %v2708_v27 = vrot.slane %v2680_v18, %v4773_v32  ;;  %v2710_v30 = vcombine.high %v2694_v19, %v2694_v19  ;;  %2782 = vst.msk [vmem:[%s4784_s9 + $0x4a] sm:$0x1] %vm629_vm2, %v2694_v19  ;;  %v2895_v31 = vcombine.high %v2893_v20, %v2893_v20  ;;  %v2909_v33 = vrot.slane %v2893_v20, %v4773_v32 }
 0x35b   : > { %v2711_v29 = vcombine.high %v2701_v21, %v2701_v21  ;;  %2779 = vst.msk [vmem:[%s4784_s9 + $0x1a] sm:$0x1] %vm629_vm2, %v2701_v21  ;;  %2780 = vst.msk [vmem:[%s4784_s9 + $0x2a] sm:$0x1] %vm629_vm2, %v2709_v9  ;;  %v2916_v22 = vrot.slane %v2894_v51, %v4773_v32  ;;  %v2924_v37 = vcombine.high %v2902_v24, %v2902_v24 }
 0x35c   : > { %2993 = vst.msk [vmem:[%s4784_s9 + $0xb] sm:$0x1] %vm629_vm2, %v2902_v24  ;;  %v3143_v38 = vcombine.high %v5034_v0, %v5034_v0  ;;  %v2712_v39 = vcombine.high %v2708_v27, %v2708_v27  ;;  %2783 = vst.msk [vmem:[%s4784_s9 + $0x5a] sm:$0x1] %vm629_vm2, %v2708_v27  ;;  %v2923_v40 = vrot.slane %v2895_v31, %v4773_v32 }
 0x35d   : > { %2784 = vst.msk [vmem:[%s4784_s9 + $0x6a] sm:$0x1] %vm629_vm2, %v2710_v30  ;;  %v2925_v41 = vcombine.high %v2909_v33, %v2909_v33  ;;  %2997 = vst.msk [vmem:[%s4784_s9 + $0x4b] sm:$0x1] %vm629_vm2, %v2909_v33  ;;  %v3150_v42 = vrot.slane %v5034_v0, %v4773_v32  ;;  %v2926_v43 = vcombine.high %v2916_v22, %v2916_v22 }
 0x35e   : > { %2781 = vst.msk [vmem:[%s4784_s9 + $0x3a] sm:$0x1] %vm629_vm2, %v2711_v29  ;;  %2994 = vst.msk [vmem:[%s4784_s9 + $0x1b] sm:$0x1] %vm629_vm2, %v2916_v22  ;;  %v3157_v2 = vrot.slane %v3143_v38, %v4773_v32  ;;  %v3358_v46 = vcombine.high %v5036_v1, %v5036_v1  ;;  %v3365_v35 = vrot.slane %v5036_v1, %v4773_v32 }
 0x35f   : > { %2995 = vst.msk [vmem:[%s4784_s9 + $0x2b] sm:$0x1] %vm629_vm2, %v2924_v37  ;;  %2785 = vst.msk [vmem:[%s4784_s9 + $0x7a] sm:$0x1] %vm629_vm2, %v2712_v39  ;;  %v2927_v0 = vcombine.high %v2923_v40, %v2923_v40  ;;  %v3158_v44 = vcombine.high %v3150_v42, %v3150_v42  ;;  %v3166_v47 = vrot.slane %v3150_v42, %v4773_v32 }
 0x360   : > { %2998 = vst.msk [vmem:[%s4784_s9 + $0x5b] sm:$0x1] %vm629_vm2, %v2923_v40  ;;  %2999 = vst.msk [vmem:[%s4784_s9 + $0x6b] sm:$0x1] %vm629_vm2, %v2925_v41  ;;  %v3094_v49 = vcombine.high %v5047_v10, %v5047_v10  ;;  %v3159_v52 = vcombine.high %v3157_v2, %v3157_v2  ;;  %v3173_v1 = vrot.slane %v3157_v2, %v4773_v32 }
 0x361   : > { %2996 = vst.msk [vmem:[%s4784_s9 + $0x3b] sm:$0x1] %vm629_vm2, %v2926_v43  ;;  %v3372_v3 = vrot.slane %v3358_v46, %v4773_v32  ;;  %v3373_v54 = vcombine.high %v3365_v35, %v3365_v35  ;;  %3000 = vst.msk [vmem:[%s4784_s9 + $0x7b] sm:$0x1] %vm629_vm2, %v2927_v0  ;;  %v3180_v55 = vrot.slane %v3158_v44, %v4773_v32 }
 0x362   : > { %v3188_v56 = vcombine.high %v3166_v47, %v3166_v47  ;;  %3216 = vst.msk [vmem:[%s4784_s9 + $0x8c] sm:$0x1] %vm629_vm2, %v3166_v47  ;;  %v3381_v57 = vrot.slane %v3365_v35, %v4773_v32  ;;  %v3101_v58 = vrot.slane %v5047_v10, %v4773_v32  ;;  %v3187_v59 = vrot.slane %v3159_v52, %v4773_v32 }
 0x363   : > { %v3189_v45 = vcombine.high %v3173_v1, %v3173_v1  ;;  %3220 = vst.msk [vmem:[%s4784_s9 + $0xcc] sm:$0x1] %vm629_vm2, %v3173_v1  ;;  %v3374_v60 = vcombine.high %v3372_v3, %v3372_v3  ;;  %v3388_v61 = vrot.slane %v3372_v3, %v4773_v32  ;;  %v3190_v48 = vcombine.high %v3180_v55, %v3180_v55 }
 0x364   : > { %3217 = vst.msk [vmem:[%s4784_s9 + $0x9c] sm:$0x1] %vm629_vm2, %v3180_v55  ;;  %3218 = vst.msk [vmem:[%s4784_s9 + $0xac] sm:$0x1] %vm629_vm2, %v3188_v56  ;;  %v3395_v62 = vrot.slane %v3373_v54, %v4773_v32  ;;  %v3403_v10 = vcombine.high %v3381_v57, %v3381_v57  ;;  %v3108_v63 = vrot.slane %v3094_v49, %v4773_v32 }
 0x365   : > { %3431 = vst.msk [vmem:[%s4784_s9 + $0x8d] sm:$0x1] %vm629_vm2, %v3381_v57  ;;  %v3191_v23 = vcombine.high %v3187_v59, %v3187_v59  ;;  %3221 = vst.msk [vmem:[%s4784_s9 + $0xdc] sm:$0x1] %vm629_vm2, %v3187_v59  ;;  %v3402_v4 = vrot.slane %v3374_v60, %v4773_v32  ;;  %v3404_v5 = vcombine.high %v3388_v61, %v3388_v61 }
 0x366   : > { %3222 = vst.msk [vmem:[%s4784_s9 + $0xec] sm:$0x1] %vm629_vm2, %v3189_v45  ;;  %3435 = vst.msk [vmem:[%s4784_s9 + $0xcd] sm:$0x1] %vm629_vm2, %v3388_v61  ;;  %v3109_v6 = vcombine.high %v3101_v58, %v3101_v58  ;;  %v3405_v7 = vcombine.high %v3395_v62, %v3395_v62  ;;  %v3110_v28 = vcombine.high %v3108_v63, %v3108_v63 }
 0x367   : > { %3219 = vst.msk [vmem:[%s4784_s9 + $0xbc] sm:$0x1] %vm629_vm2, %v3190_v48  ;;  %3432 = vst.msk [vmem:[%s4784_s9 + $0x9d] sm:$0x1] %vm629_vm2, %v3395_v62  ;;  %v3117_v12 = vrot.slane %v3101_v58, %v4773_v32  ;;  %v3124_v13 = vrot.slane %v3108_v63, %v4773_v32  ;;  %v3406_v14 = vcombine.high %v3402_v4, %v3402_v4 }
 0x368   : > { %3433 = vst.msk [vmem:[%s4784_s9 + $0xad] sm:$0x1] %vm629_vm2, %v3403_v10  ;;  %3223 = vst.msk [vmem:[%s4784_s9 + $0xfc] sm:$0x1] %vm629_vm2, %v3191_v23  ;;  %v3131_v8 = vrot.slane %v3109_v6, %v4773_v32  ;;  %v3309_v15 = vcombine.high %v5049_v11, %v5049_v11  ;;  %v3316_v50 = vrot.slane %v5049_v11, %v4773_v32 }
 0x369   : > { %3436 = vst.msk [vmem:[%s4784_s9 + $0xdd] sm:$0x1] %vm629_vm2, %v3402_v4  ;;  %3437 = vst.msk [vmem:[%s4784_s9 + $0xed] sm:$0x1] %vm629_vm2, %v3404_v5  ;;  %v3138_v16 = vrot.slane %v3110_v28, %v4773_v32  ;;  %v3139_v53 = vcombine.high %v3117_v12, %v3117_v12  ;;  %v3140_v17 = vcombine.high %v3124_v13, %v3124_v13 }
 0x36a   : > { %3434 = vst.msk [vmem:[%s4784_s9 + $0xbd] sm:$0x1] %vm629_vm2, %v3405_v7  ;;  %3208 = vst.msk [vmem:[%s4784_s9 + $0xc] sm:$0x1] %vm629_vm2, %v3117_v12  ;;  %v3573_v18 = vcombine.high %v5072_v25, %v5072_v25  ;;  %v3141_v19 = vcombine.high %v3131_v8, %v3131_v8  ;;  %v3323_v11 = vrot.slane %v3309_v15, %v4773_v32 }
 0x36b   : > { %3212 = vst.msk [vmem:[%s4784_s9 + $0x4c] sm:$0x1] %vm629_vm2, %v3124_v13  ;;  %3438 = vst.msk [vmem:[%s4784_s9 + $0xfd] sm:$0x1] %vm629_vm2, %v3406_v14  ;;  %v3324_v20 = vcombine.high %v3316_v50, %v3316_v50  ;;  %v3332_v21 = vrot.slane %v3316_v50, %v4773_v32  ;;  %v3142_v9 = vcombine.high %v3138_v16, %v3138_v16 }
 0x36c   : > { %3209 = vst.msk [vmem:[%s4784_s9 + $0x1c] sm:$0x1] %vm629_vm2, %v3131_v8  ;;  %3210 = vst.msk [vmem:[%s4784_s9 + $0x2c] sm:$0x1] %vm629_vm2, %v3139_v53  ;;  %v3580_v51 = vrot.slane %v5072_v25, %v4773_v32  ;;  %v3587_v24 = vrot.slane %v3573_v18, %v4773_v32  ;;  %v3788_v27 = vcombine.high %v5074_v26, %v5074_v26 }
 0x36d   : > { %3213 = vst.msk [vmem:[%s4784_s9 + $0x5c] sm:$0x1] %vm629_vm2, %v3138_v16  ;;  %3214 = vst.msk [vmem:[%s4784_s9 + $0x6c] sm:$0x1] %vm629_vm2, %v3140_v17  ;;  %v3325_v30 = vcombine.high %v3323_v11, %v3323_v11  ;;  %v3339_v31 = vrot.slane %v3323_v11, %v4773_v32  ;;  %v3346_v33 = vrot.slane %v3324_v20, %v4773_v32 }
 0x36e   : > { %3211 = vst.msk [vmem:[%s4784_s9 + $0x3c] sm:$0x1] %vm629_vm2, %v3141_v19  ;;  %v3354_v29 = vcombine.high %v3332_v21, %v3332_v21  ;;  %3423 = vst.msk [vmem:[%s4784_s9 + $0xd] sm:$0x1] %vm629_vm2, %v3332_v21  ;;  %v3588_v25 = vcombine.high %v3580_v51, %v3580_v51  ;;  %v3589_v22 = vcombine.high %v3587_v24, %v3587_v24 }
 0x36f   : > { %3215 = vst.msk [vmem:[%s4784_s9 + $0x7c] sm:$0x1] %vm629_vm2, %v3142_v9  ;;  %v3596_v37 = vrot.slane %v3580_v51, %v4773_v32  ;;  %v3603_v38 = vrot.slane %v3587_v24, %v4773_v32  ;;  %v3353_v39 = vrot.slane %v3325_v30, %v4773_v32  ;;  %v3355_v40 = vcombine.high %v3339_v31, %v3339_v31 }
 0x370   : > { %v3356_v41 = vcombine.high %v3346_v33, %v3346_v33  ;;  %3424 = vst.msk [vmem:[%s4784_s9 + $0x1d] sm:$0x1] %vm629_vm2, %v3346_v33  ;;  %3425 = vst.msk [vmem:[%s4784_s9 + $0x2d] sm:$0x1] %vm629_vm2, %v3354_v29  ;;  %v3795_v42 = vrot.slane %v5074_v26, %v4773_v32  ;;  %v3610_v43 = vrot.slane %v3588_v25, %v4773_v32 }
 0x371   : > { %3427 = vst.msk [vmem:[%s4784_s9 + $0x4d] sm:$0x1] %vm629_vm2, %v3339_v31  ;;  %v3617_v2 = vrot.slane %v3589_v22, %v4773_v32  ;;  %v3618_v46 = vcombine.high %v3596_v37, %v3596_v37  ;;  %v3619_v35 = vcombine.high %v3603_v38, %v3603_v38  ;;  %3646 = vst.msk [vmem:[%s4784_s9 + $0x8e] sm:$0x1] %vm629_vm2, %v3596_v37 }
 0x372   : > { %3650 = vst.msk [vmem:[%s4784_s9 + $0xce] sm:$0x1] %vm629_vm2, %v3603_v38  ;;  %v3357_v0 = vcombine.high %v3353_v39, %v3353_v39  ;;  %3426 = vst.msk [vmem:[%s4784_s9 + $0x3d] sm:$0x1] %vm629_vm2, %v3356_v41  ;;  %v3802_v26 = vrot.slane %v3788_v27, %v4773_v32  ;;  %v3803_v44 = vcombine.high %v3795_v42, %v3795_v42 }
 0x373   : > { %3428 = vst.msk [vmem:[%s4784_s9 + $0x5d] sm:$0x1] %vm629_vm2, %v3353_v39  ;;  %3429 = vst.msk [vmem:[%s4784_s9 + $0x6d] sm:$0x1] %vm629_vm2, %v3355_v40  ;;  %v3811_v47 = vrot.slane %v3795_v42, %v4773_v32  ;;  %v3620_v49 = vcombine.high %v3610_v43, %v3610_v43  ;;  %v3621_v52 = vcombine.high %v3617_v2, %v3617_v2 }
 0x374   : > { %3647 = vst.msk [vmem:[%s4784_s9 + $0x9e] sm:$0x1] %vm629_vm2, %v3610_v43  ;;  %3648 = vst.msk [vmem:[%s4784_s9 + $0xae] sm:$0x1] %vm629_vm2, %v3618_v46  ;;  %v3524_v1 = vcombine.high %v5082_v34, %v5082_v34  ;;  %v3531_v3 = vrot.slane %v5082_v34, %v4773_v32  ;;  %v3804_v54 = vcombine.high %v3802_v26, %v3802_v26 }
 0x375   : > { %3651 = vst.msk [vmem:[%s4784_s9 + $0xde] sm:$0x1] %vm629_vm2, %v3617_v2  ;;  %3652 = vst.msk [vmem:[%s4784_s9 + $0xee] sm:$0x1] %vm629_vm2, %v3619_v35  ;;  %v3818_v55 = vrot.slane %v3802_v26, %v4773_v32  ;;  %v3825_v56 = vrot.slane %v3803_v44, %v4773_v32  ;;  %v3833_v57 = vcombine.high %v3811_v47, %v3811_v47 }
 0x376   : > { %3430 = vst.msk [vmem:[%s4784_s9 + $0x7d] sm:$0x1] %vm629_vm2, %v3357_v0  ;;  %3861 = vst.msk [vmem:[%s4784_s9 + $0x8f] sm:$0x1] %vm629_vm2, %v3811_v47  ;;  %v3538_v34 = vrot.slane %v3524_v1, %v4773_v32  ;;  %v3539_v58 = vcombine.high %v3531_v3, %v3531_v3  ;;  %v3547_v59 = vrot.slane %v3531_v3, %v4773_v32 }
 0x377   : > { %3649 = vst.msk [vmem:[%s4784_s9 + $0xbe] sm:$0x1] %vm629_vm2, %v3620_v49  ;;  %3653 = vst.msk [vmem:[%s4784_s9 + $0xfe] sm:$0x1] %vm629_vm2, %v3621_v52  ;;  %v3739_v45 = vcombine.high %v5084_v36, %v5084_v36  ;;  %v3832_v60 = vrot.slane %v3804_v54, %v4773_v32  ;;  %v3834_v61 = vcombine.high %v3818_v55, %v3818_v55 }
 0x378   : > { %v3835_v48 = vcombine.high %v3825_v56, %v3825_v56  ;;  %3862 = vst.msk [vmem:[%s4784_s9 + $0x9f] sm:$0x1] %vm629_vm2, %v3825_v56  ;;  %3863 = vst.msk [vmem:[%s4784_s9 + $0xaf] sm:$0x1] %vm629_vm2, %v3833_v57  ;;  %v3746_v62 = vrot.slane %v5084_v36, %v4773_v32  ;;  %v3540_v10 = vcombine.high %v3538_v34, %v3538_v34 }
 0x379   : > { %3865 = vst.msk [vmem:[%s4784_s9 + $0xcf] sm:$0x1] %vm629_vm2, %v3818_v55  ;;  %v3554_v63 = vrot.slane %v3538_v34, %v4773_v32  ;;  %v3561_v23 = vrot.slane %v3539_v58, %v4773_v32  ;;  %v3569_v4 = vcombine.high %v3547_v59, %v3547_v59  ;;  %3638 = vst.msk [vmem:[%s4784_s9 + $0xe] sm:$0x1] %vm629_vm2, %v3547_v59 }
 0x37a   : > { %v3836_v5 = vcombine.high %v3832_v60, %v3832_v60  ;;  %3864 = vst.msk [vmem:[%s4784_s9 + $0xbf] sm:$0x1] %vm629_vm2, %v3835_v48  ;;  %3866 = vst.msk [vmem:[%s4784_s9 + $0xdf] sm:$0x1] %vm629_vm2, %v3832_v60  ;;  %v3753_v36 = vrot.slane %v3739_v45, %v4773_v32  ;;  %v3754_v6 = vcombine.high %v3746_v62, %v3746_v62 }
 0x37b   : > { %3867 = vst.msk [vmem:[%s4784_s9 + $0xef] sm:$0x1] %vm629_vm2, %v3834_v61  ;;  %v3762_v7 = vrot.slane %v3746_v62, %v4773_v32  ;;  %v3568_v28 = vrot.slane %v3540_v10, %v4773_v32  ;;  %v3570_v12 = vcombine.high %v3554_v63, %v3554_v63  ;;  %v3571_v13 = vcombine.high %v3561_v23, %v3561_v23 }
 0x37c   : > { %3639 = vst.msk [vmem:[%s4784_s9 + $0x1e] sm:$0x1] %vm629_vm2, %v3561_v23  ;;  %3640 = vst.msk [vmem:[%s4784_s9 + $0x2e] sm:$0x1] %vm629_vm2, %v3569_v4  ;;  %v3755_v14 = vcombine.high %v3753_v36, %v3753_v36  ;;  %v3769_v8 = vrot.slane %v3753_v36, %v4773_v32  ;;  %v3776_v15 = vrot.slane %v3754_v6, %v4773_v32 }
 0x37d   : > { %3642 = vst.msk [vmem:[%s4784_s9 + $0x4e] sm:$0x1] %vm629_vm2, %v3554_v63  ;;  %3868 = vst.msk [vmem:[%s4784_s9 + $0xff] sm:$0x1] %vm629_vm2, %v3836_v5  ;;  %v3784_v50 = vcombine.high %v3762_v7, %v3762_v7  ;;  %v3572_v16 = vcombine.high %v3568_v28, %v3568_v28 }
 0x37e   : > { %3853 = vst.msk [vmem:[%s4784_s9 + $0xf] sm:$0x1] %vm629_vm2, %v3762_v7  ;;  %3641 = vst.msk [vmem:[%s4784_s9 + $0x3e] sm:$0x1] %vm629_vm2, %v3571_v13  ;;  %v3783_v53 = vrot.slane %v3755_v14, %v4773_v32  ;;  %v3785_v17 = vcombine.high %v3769_v8, %v3769_v8  ;;  %v3786_v18 = vcombine.high %v3776_v15, %v3776_v15 }
 0x37f   : > { %3643 = vst.msk [vmem:[%s4784_s9 + $0x5e] sm:$0x1] %vm629_vm2, %v3568_v28  ;;  %3644 = vst.msk [vmem:[%s4784_s9 + $0x6e] sm:$0x1] %vm629_vm2, %v3570_v12 }
 0x380   : > { %3854 = vst.msk [vmem:[%s4784_s9 + $0x1f] sm:$0x1] %vm629_vm2, %v3776_v15  ;;  %3855 = vst.msk [vmem:[%s4784_s9 + $0x2f] sm:$0x1] %vm629_vm2, %v3784_v50  ;;  %v3787_v32 = vcombine.high %v3783_v53, %v3783_v53 }
 0x381   : > { %3857 = vst.msk [vmem:[%s4784_s9 + $0x4f] sm:$0x1] %vm629_vm2, %v3769_v8  ;;  %3645 = vst.msk [vmem:[%s4784_s9 + $0x7e] sm:$0x1] %vm629_vm2, %v3572_v16 }
 0x382   : > { %3856 = vst.msk [vmem:[%s4784_s9 + $0x3f] sm:$0x1] %vm629_vm2, %v3786_v18  ;;  %3858 = vst.msk [vmem:[%s4784_s9 + $0x5f] sm:$0x1] %vm629_vm2, %v3783_v53 }
 0x383   : > { %3859 = vst.msk [vmem:[%s4784_s9 + $0x6f] sm:$0x1] %vm629_vm2, %v3785_v17  ;;  %3860 = vst.msk [vmem:[%s4784_s9 + $0x7f] sm:$0x1] %vm629_vm2, %v3787_v32 }
 0x384   : > { %4392 = shalt.err (!%p4389_p5)
}
 0x385   : > { %s4393_s16 = scalar_lea.hbm %s5604_s15, 4096  ;;  %s4397_s24 = scalar_lea.hbm %s5668_s5, 8192 }
 0x386   : > { %p4394_p4 = scmp.ne.s32.totalorder %s5604_s15, %s4393_s16  ;;  %p4398_p12 = scmp.lt.u32.totalorder %s5604_s15, %s5668_s5 }
 0x387   : > { %p4399_p1 = scmp.lt.u32.totalorder %s4397_s24, %s4393_s16  ;;  %p4401_p8 = scmp.lt.u32.totalorder %s4393_s16, %s5604_s15 }
 0x388   : > { %p4395_p7 = pnand %p4394_p4, %p5676_p9 }
 0x389   : > { %p4400_p3 = por %p4399_p1, %p4398_p12 }
 0x38a   : > { %p4396_p10 = pneg %p4395_p7 }
 0x38b   : > { %p4402_p11 = por %p4401_p8, %p4400_p3 }
 0x38d   : > { %p4403_p0 = pnand %p4402_p11, %p4396_p10 }
 0x38f   : > { %4406 = shalt.err (!%p4403_p0)
}
 0x390   : > { %s4477_s21 = smov 128   ;;  %s4478_s13 = smov 8  }
 0x391   : > { %4273 = dma.vmem_to_hbm [thread:$0]  (%p5676_p9), %s5606_s30, 4096, %s5604_s15, %s3870_s25, %s4477_s21, %s4477_s21, %s4478_s13  }
 0x392 PF: > { %s3900_s27 = sand.u32 1, %s4441_s18   ;;  %p5677_p6 = scmp.ne.s32.totalorder %s5673_s8, 0 }
 0x393   : > { %p5678_p13 = scmp.ge.s32.totalorder %s4461_s23, 2  ;;  %s3901_s28 = scalar_lea.sflag [#allocation4], %s3900_s27 }
 0x395   : > { %p4280_p2 = pnand %p5678_p13, %p5677_p6 }
 0x397   : > { %4436 = dma.done.wait (!%p4280_p2), %s3901_s28, 4096  }
 0x398   : > { %4438 = vsyncadd (!%p4280_p2), %s3901_s28, 4294963200  ;;  %s21_s23 = sadd.s32 1, %s4461_s23   ;;  %s5679_s18 = smov %s4445_s19 }
 0x399   : > { %p18_p5 = scmp.ge.s32.totalorder %s21_s23, 4   ;;  %s5680_s19 = smov %s4449_s20 }
 0x39a   : > { %s5681_s20 = smov %s4565_s7  ;;  %s5682_s21 = smov %s4457_s22 }
 0x39b   : > { %s5683_s22 = smov %s5685_s26  ;;  %20 = sbr.rel (!%p18_p5) target bundleno = 6 (0x6), region = 85 }
 0x3a2   :  { %3906 = vsyncpa [#allocation3], 1 }
 0x3a3   :  { %3908 = vsyncpa [#allocation3 + $0x1], 1 }
 0x3a4   :  { %3909 = vsyncpa [#allocation4], 1 }
 0x3a5   :  { %3911 = vsyncpa [#allocation4 + $0x1], 1 }

</bundles_post_ra>
